<compile_context>
chip_gen: v7x
topology: tpu7x:2x2x1
jax: 0.10.0
libtpu: 0.0.40
codegen_flags: <defaults>
</compile_context>

<pallas_src>
import functools
import math

import numpy as np
import jax
import jax.numpy as jnp
from jax.experimental import pallas as pl
from jax.experimental.pallas import tpu as pltpu


def _ln(v, gamma, beta, eps=1e-5):
    """LayerNorm over last dim. v: (R, D); gamma/beta: (1, D)."""
    mu = jnp.mean(v, axis=-1, keepdims=True)
    var = jnp.mean(jnp.square(v - mu), axis=-1, keepdims=True)
    return (v - mu) * jax.lax.rsqrt(var + eps) * gamma + beta


def _fused_encoder_kernel(
    x_ref,                      # (TB, S, D)    input block (consumed at layer 0 only)
    wq_ref, wk_ref, wv_ref,     # (1, D, D)     bf16 (Q scale pre-folded into wq)
    bq_ref, bk_ref, bv_ref,     # (1, 1, D)     f32
    wo_ref,                     # (1, H, hd, D) bf16, output projection split per head
    bo_ref,                     # (1, 1, D)
    w1_ref,                     # (1, C, D, Fc) bf16, FFN up, chunked over Dff
    b1_ref,                     # (1, C, 1, Fc)
    w2_ref,                     # (1, C, Fc, D) bf16, FFN down, chunked over Dff
    b2_ref,                     # (1, 1, D)
    g1_ref, be1_ref, g2_ref, be2_ref,   # (1, 1, D) LayerNorm params
    out_ref,                    # (TB, S, D)    final output (written on last layer only)
    *rest,                      # [attn_ref (1, TB, S, S) if need_weights] + carry scratch
    nhead: int,
    need_weights: bool,
):
    if need_weights:
        attn_ref, carry_ref = rest
    else:
        (carry_ref,) = rest

    layer = pl.program_id(1)
    n_layers = pl.num_programs(1)

    TB, S, D = carry_ref.shape
    hd = D // nhead
    R = TB * S

    # Residual stream: select the HBM input at layer 0, else the f32 VMEM carry
    # (no store+reload round trip; carry stays f32 regardless of src dtype).
    x3 = jnp.where(layer == 0, x_ref[...].astype(jnp.float32), carry_ref[...])
    x = x3.reshape(R, D)
    x_bf = x.astype(jnp.bfloat16)

    # --- self attention -----------------------------------------------------
    # Three N=D projections (no f32 (R, 3D) intermediate); bf16 operands, f32 acc.
    def proj(w_ref, b_ref):
        return (jnp.dot(x_bf, w_ref[0], preferred_element_type=jnp.float32)
                + b_ref[0]).astype(jnp.bfloat16).reshape(TB, S, D)

    q = proj(wq_ref, bq_ref)          # Q scale (1/sqrt(hd)) folded into wq/bq
    k = proj(wk_ref, bk_ref)
    v = proj(wv_ref, bv_ref)

    # Per-head: scores -> softmax -> (p @ V_h) @ Wo_h accumulated directly into the
    # (R, D) attention output: no ctx concat, per-head f32 buffers die immediately.
    # TODO(synk): for large S use flash-style kv tiling (online softmax) instead of
    #             materializing (S, S) scores per head.
    # TODO(synk): per-head lane slices (width hd) may relayout when hd % 128 != 0;
    #             head-major padded q/k/v packing would remove it if it shows up.
    # TODO(synk): no src_mask / src_key_padding_mask path (None in this instantiation).
    attn_out = jnp.zeros((R, D), jnp.float32)
    if need_weights:
        attn_acc = jnp.zeros((TB, S, S), jnp.float32)
    for h in range(nhead):                            # static unroll, batched over TB
        lo = h * hd
        q_h = q[..., lo:lo + hd]
        k_h = k[..., lo:lo + hd]
        v_h = v[..., lo:lo + hd]
        s = jnp.einsum('bqd,bkd->bqk', q_h, k_h,
                       preferred_element_type=jnp.float32)            # (TB, S, S)
        s = s - jnp.max(s, axis=-1, keepdims=True)
        e = jnp.exp(s)
        denom = jnp.sum(e, axis=-1, keepdims=True)
        # exact reciprocal when the weights are user-visible, EUP approx otherwise
        p = e * pl.reciprocal(denom, approx=not need_weights)
        if need_weights:
            attn_acc = attn_acc + p
        ctx_h = jnp.einsum('bqk,bkd->bqd', p.astype(jnp.bfloat16), v_h,
                           preferred_element_type=jnp.float32)         # (TB, S, hd)
        attn_out = attn_out + jnp.dot(ctx_h.reshape(R, hd).astype(jnp.bfloat16),
                                      wo_ref[0, h],
                                      preferred_element_type=jnp.float32)
    attn_out = attn_out + bo_ref[0]
    if need_weights:
        attn_ref[0] = (attn_acc * (1.0 / nhead)).astype(attn_ref.dtype)  # head average

    # --- add & norm 1 (dropout is identity: eval mode / p=0) -----------------
    y = _ln(x + attn_out, g1_ref[0], be1_ref[0])
    y_bf = y.astype(jnp.bfloat16)

    # --- feed-forward (relu), chunked over Dff: h1 never a full (R, Dff) f32 --
    n_chunks = w1_ref.shape[1]
    h2 = jnp.zeros((R, D), jnp.float32)
    for c in range(n_chunks):                          # static unroll
        h1c = jnp.dot(y_bf, w1_ref[0, c], preferred_element_type=jnp.float32) + b1_ref[0, c]
        h1c = jnp.maximum(h1c, 0.0)
        h2 = h2 + jnp.dot(h1c.astype(jnp.bfloat16), w2_ref[0, c],
                          preferred_element_type=jnp.float32)
    h2 = h2 + b2_ref[0]

    # --- add & norm 2 -> residual carry / final output ------------------------
    out = _ln(y + h2, g2_ref[0], be2_ref[0]).reshape(TB, S, D)

    @pl.when(layer < n_layers - 1)
    def _():
        carry_ref[...] = out                           # f32 carry between layers

    @pl.when(layer == n_layers - 1)
    def _():
        out_ref[...] = out.astype(out_ref.dtype)


# ----------------------------- sizing helpers ----------------------------------

def _largest_divisor_leq(n, cap):
    d = max(1, min(n, cap))
    while n % d:
        d -= 1
    return d


def _vmem_budget_bytes():
    """Per-generation scoped-VMEM budget (v7x: ~38 MiB of 64; v5e/v6e: ~77 of 128)."""
    try:
        cap = int(pltpu.get_tpu_info().vmem_capacity_bytes)
    except Exception:
        cap = 64 * 1024 * 1024
    return max(32 * 1024 * 1024, min(int(cap * 0.6), 100 * 1024 * 1024))


def _estimate_vmem_bytes(tb, S, D, Dff, ffc, need_weights, x_bytes, attn_bytes):
    R = tb * S
    weights = 2 * 2 * (4 * D * D + 2 * D * Dff)                 # double-buffered bf16 weights
    io = 2 * tb * S * D * x_bytes * 2                           # input + output blocks
    io += (2 * tb * S * S * attn_bytes) if need_weights else 0  # attention-weight block
    carry = R * D * 4                                           # f32 residual scratch
    acts = R * D * 26 + R * ffc * 6 + tb * S * S * 10           # rough peak temporaries
    return int(1.3 * (weights + io + carry + acts))


def _pick_block_b(B, S, D, Dff, ffc, need_weights, x_bytes, attn_bytes, budget,
                  target_rows=512):
    divs = [d for d in range(1, B + 1) if B % d == 0]
    # smallest batch block whose row count amortizes the per-layer weight stream
    cand = next((d for d in divs if d * S >= target_rows), B)
    # shrink until the estimated VMEM footprint fits the per-generation budget
    while cand > 1 and _estimate_vmem_bytes(cand, S, D, Dff, ffc, need_weights,
                                            x_bytes, attn_bytes) > budget:
        cand = max(d for d in divs if d < cand)
    return cand


# --------------------------------- wrapper --------------------------------------

def transformer_encoder(src, params, nhead, block_b=None, need_weights=True,
                        attn_dtype=None):
    """src: (S, B, D) seq-first (PyTorch). Returns (output (S,B,D), [attn (B,S,S)] * L)."""
    S, B, D = src.shape
    L, n_chunks, _, ffc = params['w1'].shape
    Dff = n_chunks * ffc
    if attn_dtype is None:
        attn_dtype = src.dtype     # pass jnp.bfloat16 to halve the attention writeback

    x = jnp.transpose(src, (1, 0, 2))                 # -> (B, S, D) batch-major

    budget = _vmem_budget_bytes()
    if block_b is None:
        block_b = _pick_block_b(B, S, D, Dff, ffc, need_weights,
                                np.dtype(src.dtype).itemsize,
                                np.dtype(attn_dtype).itemsize, budget)
    assert B % block_b == 0, "batch must be divisible by the batch block"
    nb = B // block_b

    kernel = functools.partial(_fused_encoder_kernel, nhead=nhead,
                               need_weights=need_weights)

    def wspec(shape):
        zeros = (0,) * len(shape)
        return pl.BlockSpec((1,) + tuple(shape), lambda b, l, _z=zeros: (l,) + _z)

    in_specs = [
        pl.BlockSpec((block_b, S, D), lambda b, l: (b, 0, 0)),     # x
        wspec((D, D)), wspec((D, D)), wspec((D, D)),               # wq, wk, wv (bf16)
        wspec((1, D)), wspec((1, D)), wspec((1, D)),               # bq, bk, bv
        wspec((nhead, D // nhead, D)),                             # wo per head (bf16)
        wspec((1, D)),                                             # bo
        wspec((n_chunks, D, ffc)),                                 # w1 chunked (bf16)
        wspec((n_chunks, 1, ffc)),                                 # b1
        wspec((n_chunks, ffc, D)),                                 # w2 chunked (bf16)
        wspec((1, D)),                                             # b2
        wspec((1, D)), wspec((1, D)),                              # ln1 gamma/beta
        wspec((1, D)), wspec((1, D)),                              # ln2 gamma/beta
    ]
    out_shape = [jax.ShapeDtypeStruct((B, S, D), src.dtype)]
    out_specs = [pl.BlockSpec((block_b, S, D), lambda b, l: (b, 0, 0))]
    if need_weights:
        # TODO(synk): pad S to a multiple of 128 for a lane-dense attention store at
        #             real sequence lengths (demo shapes are tiny).
        out_shape.append(jax.ShapeDtypeStruct((L, B, S, S), attn_dtype))
        out_specs.append(pl.BlockSpec((1, block_b, S, S), lambda b, l: (l, b, 0, 0)))

    results = pl.pallas_call(
        kernel,
        out_shape=tuple(out_shape),
        grid=(nb, L),                                   # layer axis innermost (sequential)
        in_specs=in_specs,
        out_specs=tuple(out_specs),
        scratch_shapes=[pltpu.VMEM((block_b, S, D), jnp.float32)],   # f32 residual carry
        compiler_params=pltpu.CompilerParams(
            dimension_semantics=("parallel", "arbitrary"),
            vmem_limit_bytes=budget,
        ),
    )(x, params['wq'], params['wk'], params['wv'],
      params['bq'], params['bk'], params['bv'],
      params['wo'], params['bo'],
      params['w1'], params['b1'], params['w2'], params['b2'],
      params['g1'], params['be1'], params['g2'], params['be2'])

    if need_weights:
        out, attn = results
        attns = [attn[l] for l in range(L)]
    else:
        out = results[0] if isinstance(results, (tuple, list)) else results
        attns = []
    out = jnp.transpose(out, (1, 0, 2))                 # -> (S, B, D)
    return out, attns


# ----------------------------- parameter prep -----------------------------------

def init_layer_params(key, d_model, nhead, dim_ff):
    """PyTorch-shaped f32 parameters for one encoder layer."""
    ks = jax.random.split(key, 4)
    scale = 0.02
    return {
        'in_proj_w':  scale * jax.random.normal(ks[0], (3 * d_model, d_model), jnp.float32),
        'in_proj_b':  jnp.zeros((3 * d_model,), jnp.float32),
        'out_proj_w': scale * jax.random.normal(ks[1], (d_model, d_model), jnp.float32),
        'out_proj_b': jnp.zeros((d_model,), jnp.float32),
        'lin1_w':     scale * jax.random.normal(ks[2], (dim_ff, d_model), jnp.float32),
        'lin1_b':     jnp.zeros((dim_ff,), jnp.float32),
        'lin2_w':     scale * jax.random.normal(ks[3], (d_model, dim_ff), jnp.float32),
        'lin2_b':     jnp.zeros((d_model,), jnp.float32),
        'ln1_g': jnp.ones((d_model,), jnp.float32), 'ln1_b': jnp.zeros((d_model,), jnp.float32),
        'ln2_g': jnp.ones((d_model,), jnp.float32), 'ln2_b': jnp.zeros((d_model,), jnp.float32),
    }


def prepare_params(layer_params, d_model, nhead, ff_chunk=None):
    """Transpose to x@W layout, split the fused in-projection into Q/K/V, fold
    1/sqrt(head_dim) into the Q projection, lay out Wo per head and W1/W2 in Dff
    chunks, cast weight matrices to bf16, and stack across layers."""
    hd = d_model // nhead
    dim_ff = layer_params[0]['lin1_w'].shape[0]
    if ff_chunk is None:
        ff_chunk = _largest_divisor_leq(dim_ff, 512)
    assert dim_ff % ff_chunk == 0
    n_chunks = dim_ff // ff_chunk
    q_scale = 1.0 / math.sqrt(hd)

    keys = ('wq', 'wk', 'wv', 'bq', 'bk', 'bv', 'wo', 'bo',
            'w1', 'b1', 'w2', 'b2', 'g1', 'be1', 'g2', 'be2')
    acc = {k: [] for k in keys}
    for p in layer_params:
        w_in, b_in = p['in_proj_w'], p['in_proj_b']
        acc['wq'].append((w_in[:d_model].T * q_scale).astype(jnp.bfloat16))
        acc['wk'].append(w_in[d_model:2 * d_model].T.astype(jnp.bfloat16))
        acc['wv'].append(w_in[2 * d_model:].T.astype(jnp.bfloat16))
        acc['bq'].append((b_in[:d_model] * q_scale).reshape(1, -1))
        acc['bk'].append(b_in[d_model:2 * d_model].reshape(1, -1))
        acc['bv'].append(b_in[2 * d_model:].reshape(1, -1))
        acc['wo'].append(p['out_proj_w'].T.reshape(nhead, hd, d_model).astype(jnp.bfloat16))
        acc['bo'].append(p['out_proj_b'].reshape(1, -1))
        w1 = p['lin1_w'].T.reshape(d_model, n_chunks, ff_chunk).transpose(1, 0, 2)
        acc['w1'].append(w1.astype(jnp.bfloat16))                         # (C, D, Fc)
        acc['b1'].append(p['lin1_b'].reshape(n_chunks, 1, ff_chunk))
        acc['w2'].append(p['lin2_w'].T.reshape(n_chunks, ff_chunk, d_model)
                         .astype(jnp.bfloat16))                           # (C, Fc, D)
        acc['b2'].append(p['lin2_b'].reshape(1, -1))
        acc['g1'].append(p['ln1_g'].reshape(1, -1))
        acc['be1'].append(p['ln1_b'].reshape(1, -1))
        acc['g2'].append(p['ln2_g'].reshape(1, -1))
        acc['be2'].append(p['ln2_b'].reshape(1, -1))
    return {k: jnp.stack(v, axis=0) for k, v in acc.items()}


if __name__ == "__main__":
    S, B, D = 8, 2, 32        # seq, batch, d_model
    NHEAD = 4
    DIM_FF = 64
    NUM_LAYERS = 2

    key = jax.random.PRNGKey(0)
    k_src, k_par = jax.random.split(key)
    src = jax.random.normal(k_src, (S, B, D), jnp.float32)
    layer_params = [init_layer_params(jax.random.fold_in(k_par, l), D, NHEAD, DIM_FF)
                    for l in range(NUM_LAYERS)]
    params = prepare_params(layer_params, D, NHEAD)

    out, attns = transformer_encoder(src, params, NHEAD)
    out = jax.block_until_ready(out)
    for a in attns:
        jax.block_until_ready(a)

    assert out.shape == (S, B, D)
    assert len(attns) == NUM_LAYERS and attns[0].shape == (B, S, S)
    print("KERNEL_OK")
</pallas_src>

<mosaic_0001>
module attributes {stable_mosaic.version = 11 : i64} {
  func.func @_fused_encoder_kernel(%arg0: i32, %arg1: i32, %arg2: memref<2x8x32xf32, #tpu.memory_space<vmem>>, %arg3: memref<1x32x32xbf16, #tpu.memory_space<vmem>>, %arg4: memref<1x32x32xbf16, #tpu.memory_space<vmem>>, %arg5: memref<1x32x32xbf16, #tpu.memory_space<vmem>>, %arg6: memref<1x1x32xf32, #tpu.memory_space<vmem>>, %arg7: memref<1x1x32xf32, #tpu.memory_space<vmem>>, %arg8: memref<1x1x32xf32, #tpu.memory_space<vmem>>, %arg9: memref<1x4x8x32xbf16, #tpu.memory_space<vmem>>, %arg10: memref<1x1x32xf32, #tpu.memory_space<vmem>>, %arg11: memref<1x1x32x64xbf16, #tpu.memory_space<vmem>>, %arg12: memref<1x1x1x64xf32, #tpu.memory_space<vmem>>, %arg13: memref<1x1x64x32xbf16, #tpu.memory_space<vmem>>, %arg14: memref<1x1x32xf32, #tpu.memory_space<vmem>>, %arg15: memref<1x1x32xf32, #tpu.memory_space<vmem>>, %arg16: memref<1x1x32xf32, #tpu.memory_space<vmem>>, %arg17: memref<1x1x32xf32, #tpu.memory_space<vmem>>, %arg18: memref<1x1x32xf32, #tpu.memory_space<vmem>>, %arg19: memref<2x8x32xf32, #tpu.memory_space<vmem>>, %arg20: memref<1x2x8x8xf32, #tpu.memory_space<vmem>>, %arg21: memref<2x8x32xf32, #tpu.memory_space<vmem>>) attributes {dimension_semantics = [#tpu.dimension_semantics<parallel>, #tpu.dimension_semantics<arbitrary>], iteration_bounds = array<i64: 1, 2>, scalar_prefetch = 0 : i64, scratch_operands = 1 : i64, tpu.core_type = #tpu.core_type<tc>, window_params = [{transform_indices = @transform_0, window_bounds = array<i64: 2, 8, 32>}, {transform_indices = @transform_1, window_bounds = array<i64: 1, 32, 32>}, {transform_indices = @transform_2, window_bounds = array<i64: 1, 32, 32>}, {transform_indices = @transform_3, window_bounds = array<i64: 1, 32, 32>}, {transform_indices = @transform_4, window_bounds = array<i64: 1, 1, 32>}, {transform_indices = @transform_5, window_bounds = array<i64: 1, 1, 32>}, {transform_indices = @transform_6, window_bounds = array<i64: 1, 1, 32>}, {transform_indices = @transform_7, window_bounds = array<i64: 1, 4, 8, 32>}, {transform_indices = @transform_8, window_bounds = array<i64: 1, 1, 32>}, {transform_indices = @transform_9, window_bounds = array<i64: 1, 1, 32, 64>}, {transform_indices = @transform_10, window_bounds = array<i64: 1, 1, 1, 64>}, {transform_indices = @transform_11, window_bounds = array<i64: 1, 1, 64, 32>}, {transform_indices = @transform_12, window_bounds = array<i64: 1, 1, 32>}, {transform_indices = @transform_13, window_bounds = array<i64: 1, 1, 32>}, {transform_indices = @transform_14, window_bounds = array<i64: 1, 1, 32>}, {transform_indices = @transform_15, window_bounds = array<i64: 1, 1, 32>}, {transform_indices = @transform_16, window_bounds = array<i64: 1, 1, 32>}, {transform_indices = @transform_17, window_bounds = array<i64: 2, 8, 32>}, {transform_indices = @transform_18, window_bounds = array<i64: 1, 2, 8, 8>}]} {
    %c0_i32 = arith.constant 0 : i32
    %0 = arith.cmpi eq, %arg1, %c0_i32 : i32
    %c0 = arith.constant 0 : index
    %c0_0 = arith.constant 0 : index
    %c0_1 = arith.constant 0 : index
    %1 = vector.load %arg2[%c0, %c0_0, %c0_1] : memref<2x8x32xf32, #tpu.memory_space<vmem>>, vector<2x8x32xf32>
    %c0_2 = arith.constant 0 : index
    %c0_3 = arith.constant 0 : index
    %c0_4 = arith.constant 0 : index
    %2 = vector.load %arg21[%c0_2, %c0_3, %c0_4] : memref<2x8x32xf32, #tpu.memory_space<vmem>>, vector<2x8x32xf32>
    %3 = arith.select %0, %1, %2 : vector<2x8x32xf32>
    %4 = vector.shape_cast %3 : vector<2x8x32xf32> to vector<16x32xf32>
    %5 = arith.truncf %4 : vector<16x32xf32> to vector<16x32xbf16>
    %c0_5 = arith.constant 0 : index
    %c0_6 = arith.constant 0 : index
    %c0_7 = arith.constant 0 : index
    %6 = vector.load %arg3[%c0_5, %c0_6, %c0_7] : memref<1x32x32xbf16, #tpu.memory_space<vmem>>, vector<1x32x32xbf16>
    %7 = vector.shape_cast %6 : vector<1x32x32xbf16> to vector<32x32xbf16>
    %cst = arith.constant dense<0.000000e+00> : vector<16x32xf32>
    %8 = tpu.matmul %5, %7, %cst {dimension_numbers = #tpu.dot_dimension_numbers<[1], [0], [0], [1], [0, 0, 1, 1], [], []>} : vector<16x32xbf16>, vector<32x32xbf16>, vector<16x32xf32> -> vector<16x32xf32>
    %c0_8 = arith.constant 0 : index
    %c0_9 = arith.constant 0 : index
    %c0_10 = arith.constant 0 : index
    %9 = vector.load %arg6[%c0_8, %c0_9, %c0_10] : memref<1x1x32xf32, #tpu.memory_space<vmem>>, vector<1x1x32xf32>
    %10 = vector.shape_cast %9 : vector<1x1x32xf32> to vector<1x32xf32>
    %11 = vector.broadcast %10 : vector<1x32xf32> to vector<16x32xf32>
    %12 = arith.addf %8, %11 : vector<16x32xf32>
    %13 = arith.truncf %12 : vector<16x32xf32> to vector<16x32xbf16>
    %14 = vector.shape_cast %13 : vector<16x32xbf16> to vector<2x8x32xbf16>
    %c0_11 = arith.constant 0 : index
    %c0_12 = arith.constant 0 : index
    %c0_13 = arith.constant 0 : index
    %15 = vector.load %arg4[%c0_11, %c0_12, %c0_13] : memref<1x32x32xbf16, #tpu.memory_space<vmem>>, vector<1x32x32xbf16>
    %16 = vector.shape_cast %15 : vector<1x32x32xbf16> to vector<32x32xbf16>
    %cst_14 = arith.constant dense<0.000000e+00> : vector<16x32xf32>
    %17 = tpu.matmul %5, %16, %cst_14 {dimension_numbers = #tpu.dot_dimension_numbers<[1], [0], [0], [1], [0, 0, 1, 1], [], []>} : vector<16x32xbf16>, vector<32x32xbf16>, vector<16x32xf32> -> vector<16x32xf32>
    %c0_15 = arith.constant 0 : index
    %c0_16 = arith.constant 0 : index
    %c0_17 = arith.constant 0 : index
    %18 = vector.load %arg7[%c0_15, %c0_16, %c0_17] : memref<1x1x32xf32, #tpu.memory_space<vmem>>, vector<1x1x32xf32>
    %19 = vector.shape_cast %18 : vector<1x1x32xf32> to vector<1x32xf32>
    %20 = vector.broadcast %19 : vector<1x32xf32> to vector<16x32xf32>
    %21 = arith.addf %17, %20 : vector<16x32xf32>
    %22 = arith.truncf %21 : vector<16x32xf32> to vector<16x32xbf16>
    %23 = vector.shape_cast %22 : vector<16x32xbf16> to vector<2x8x32xbf16>
    %c0_18 = arith.constant 0 : index
    %c0_19 = arith.constant 0 : index
    %c0_20 = arith.constant 0 : index
    %24 = vector.load %arg5[%c0_18, %c0_19, %c0_20] : memref<1x32x32xbf16, #tpu.memory_space<vmem>>, vector<1x32x32xbf16>
    %25 = vector.shape_cast %24 : vector<1x32x32xbf16> to vector<32x32xbf16>
    %cst_21 = arith.constant dense<0.000000e+00> : vector<16x32xf32>
    %26 = tpu.matmul %5, %25, %cst_21 {dimension_numbers = #tpu.dot_dimension_numbers<[1], [0], [0], [1], [0, 0, 1, 1], [], []>} : vector<16x32xbf16>, vector<32x32xbf16>, vector<16x32xf32> -> vector<16x32xf32>
    %c0_22 = arith.constant 0 : index
    %c0_23 = arith.constant 0 : index
    %c0_24 = arith.constant 0 : index
    %27 = vector.load %arg8[%c0_22, %c0_23, %c0_24] : memref<1x1x32xf32, #tpu.memory_space<vmem>>, vector<1x1x32xf32>
    %28 = vector.shape_cast %27 : vector<1x1x32xf32> to vector<1x32xf32>
    %29 = vector.broadcast %28 : vector<1x32xf32> to vector<16x32xf32>
    %30 = arith.addf %26, %29 : vector<16x32xf32>
    %31 = arith.truncf %30 : vector<16x32xf32> to vector<16x32xbf16>
    %32 = vector.shape_cast %31 : vector<16x32xbf16> to vector<2x8x32xbf16>
    %cst_25 = arith.constant 0.000000e+00 : f32
    %33 = vector.broadcast %cst_25 : f32 to vector<16x32xf32>
    %cst_26 = arith.constant 0.000000e+00 : f32
    %34 = vector.broadcast %cst_26 : f32 to vector<2x8x8xf32>
    %35 = vector.extract_strided_slice %14 {offsets = [0, 0, 0], sizes = [2, 8, 8], strides = [1, 1, 1]} : vector<2x8x32xbf16> to vector<2x8x8xbf16>
    %36 = vector.extract_strided_slice %23 {offsets = [0, 0, 0], sizes = [2, 8, 8], strides = [1, 1, 1]} : vector<2x8x32xbf16> to vector<2x8x8xbf16>
    %37 = vector.extract_strided_slice %32 {offsets = [0, 0, 0], sizes = [2, 8, 8], strides = [1, 1, 1]} : vector<2x8x32xbf16> to vector<2x8x8xbf16>
    "tpu.trace_start"() <{level = 10 : i32, message = "bqd,bkd->bqk"}> : () -> ()
    %cst_27 = arith.constant dense<0.000000e+00> : vector<2x8x8xf32>
    %38 = tpu.matmul %35, %36, %cst_27 {dimension_numbers = #tpu.dot_dimension_numbers<[2], [2], [1], [1], [0, 0, 0, 1, 1, 1], [0], [0]>} : vector<2x8x8xbf16>, vector<2x8x8xbf16>, vector<2x8x8xf32> -> vector<2x8x8xf32>
    "tpu.trace_stop"() : () -> ()
    %cst_28 = arith.constant dense<0xFF800000> : vector<2x8xf32>
    %39 = vector.multi_reduction <maximumf>, %38, %cst_28 [2] : vector<2x8x8xf32> to vector<2x8xf32>
    %40 = vector.shape_cast %39 : vector<2x8xf32> to vector<2x8x1xf32>
    %41 = vector.broadcast %40 : vector<2x8x1xf32> to vector<2x8x8xf32>
    %42 = arith.subf %38, %41 : vector<2x8x8xf32>
    %43 = math.exp %42 : vector<2x8x8xf32>
    %cst_29 = arith.constant dense<0.000000e+00> : vector<2x8xf32>
    %44 = vector.multi_reduction <add>, %43, %cst_29 [2] : vector<2x8x8xf32> to vector<2x8xf32>
    %45 = vector.shape_cast %44 : vector<2x8xf32> to vector<2x8x1xf32>
    %46 = tpu.reciprocal %45 : vector<2x8x1xf32> -> vector<2x8x1xf32>
    %47 = vector.broadcast %46 : vector<2x8x1xf32> to vector<2x8x8xf32>
    %48 = arith.mulf %43, %47 : vector<2x8x8xf32>
    %49 = arith.addf %34, %48 : vector<2x8x8xf32>
    %50 = arith.truncf %48 : vector<2x8x8xf32> to vector<2x8x8xbf16>
    "tpu.trace_start"() <{level = 10 : i32, message = "bqk,bkd->bqd"}> : () -> ()
    %cst_30 = arith.constant dense<0.000000e+00> : vector<2x8x8xf32>
    %51 = tpu.matmul %50, %37, %cst_30 {dimension_numbers = #tpu.dot_dimension_numbers<[2], [1], [1], [2], [0, 0, 0, 1, 1, 2], [0], [0]>} : vector<2x8x8xbf16>, vector<2x8x8xbf16>, vector<2x8x8xf32> -> vector<2x8x8xf32>
    "tpu.trace_stop"() : () -> ()
    %52 = vector.shape_cast %51 : vector<2x8x8xf32> to vector<16x8xf32>
    %53 = arith.truncf %52 : vector<16x8xf32> to vector<16x8xbf16>
    %c0_31 = arith.constant 0 : index
    %c0_32 = arith.constant 0 : index
    %c0_33 = arith.constant 0 : index
    %c0_34 = arith.constant 0 : index
    %54 = vector.load %arg9[%c0_31, %c0_32, %c0_33, %c0_34] : memref<1x4x8x32xbf16, #tpu.memory_space<vmem>>, vector<1x1x8x32xbf16>
    %55 = vector.shape_cast %54 : vector<1x1x8x32xbf16> to vector<8x32xbf16>
    %cst_35 = arith.constant dense<0.000000e+00> : vector<16x32xf32>
    %56 = tpu.matmul %53, %55, %cst_35 {dimension_numbers = #tpu.dot_dimension_numbers<[1], [0], [0], [1], [0, 0, 1, 1], [], []>} : vector<16x8xbf16>, vector<8x32xbf16>, vector<16x32xf32> -> vector<16x32xf32>
    %57 = arith.addf %33, %56 : vector<16x32xf32>
    %58 = vector.extract_strided_slice %14 {offsets = [0, 0, 8], sizes = [2, 8, 8], strides = [1, 1, 1]} : vector<2x8x32xbf16> to vector<2x8x8xbf16>
    %59 = vector.extract_strided_slice %23 {offsets = [0, 0, 8], sizes = [2, 8, 8], strides = [1, 1, 1]} : vector<2x8x32xbf16> to vector<2x8x8xbf16>
    %60 = vector.extract_strided_slice %32 {offsets = [0, 0, 8], sizes = [2, 8, 8], strides = [1, 1, 1]} : vector<2x8x32xbf16> to vector<2x8x8xbf16>
    "tpu.trace_start"() <{level = 10 : i32, message = "bqd,bkd->bqk"}> : () -> ()
    %cst_36 = arith.constant dense<0.000000e+00> : vector<2x8x8xf32>
    %61 = tpu.matmul %58, %59, %cst_36 {dimension_numbers = #tpu.dot_dimension_numbers<[2], [2], [1], [1], [0, 0, 0, 1, 1, 1], [0], [0]>} : vector<2x8x8xbf16>, vector<2x8x8xbf16>, vector<2x8x8xf32> -> vector<2x8x8xf32>
    "tpu.trace_stop"() : () -> ()
    %cst_37 = arith.constant dense<0xFF800000> : vector<2x8xf32>
    %62 = vector.multi_reduction <maximumf>, %61, %cst_37 [2] : vector<2x8x8xf32> to vector<2x8xf32>
    %63 = vector.shape_cast %62 : vector<2x8xf32> to vector<2x8x1xf32>
    %64 = vector.broadcast %63 : vector<2x8x1xf32> to vector<2x8x8xf32>
    %65 = arith.subf %61, %64 : vector<2x8x8xf32>
    %66 = math.exp %65 : vector<2x8x8xf32>
    %cst_38 = arith.constant dense<0.000000e+00> : vector<2x8xf32>
    %67 = vector.multi_reduction <add>, %66, %cst_38 [2] : vector<2x8x8xf32> to vector<2x8xf32>
    %68 = vector.shape_cast %67 : vector<2x8xf32> to vector<2x8x1xf32>
    %69 = tpu.reciprocal %68 : vector<2x8x1xf32> -> vector<2x8x1xf32>
    %70 = vector.broadcast %69 : vector<2x8x1xf32> to vector<2x8x8xf32>
    %71 = arith.mulf %66, %70 : vector<2x8x8xf32>
    %72 = arith.addf %49, %71 : vector<2x8x8xf32>
    %73 = arith.truncf %71 : vector<2x8x8xf32> to vector<2x8x8xbf16>
    "tpu.trace_start"() <{level = 10 : i32, message = "bqk,bkd->bqd"}> : () -> ()
    %cst_39 = arith.constant dense<0.000000e+00> : vector<2x8x8xf32>
    %74 = tpu.matmul %73, %60, %cst_39 {dimension_numbers = #tpu.dot_dimension_numbers<[2], [1], [1], [2], [0, 0, 0, 1, 1, 2], [0], [0]>} : vector<2x8x8xbf16>, vector<2x8x8xbf16>, vector<2x8x8xf32> -> vector<2x8x8xf32>
    "tpu.trace_stop"() : () -> ()
    %75 = vector.shape_cast %74 : vector<2x8x8xf32> to vector<16x8xf32>
    %76 = arith.truncf %75 : vector<16x8xf32> to vector<16x8xbf16>
    %c0_40 = arith.constant 0 : index
    %c1 = arith.constant 1 : index
    %c0_41 = arith.constant 0 : index
    %c0_42 = arith.constant 0 : index
    %77 = vector.load %arg9[%c0_40, %c1, %c0_41, %c0_42] : memref<1x4x8x32xbf16, #tpu.memory_space<vmem>>, vector<1x1x8x32xbf16>
    %78 = vector.shape_cast %77 : vector<1x1x8x32xbf16> to vector<8x32xbf16>
    %cst_43 = arith.constant dense<0.000000e+00> : vector<16x32xf32>
    %79 = tpu.matmul %76, %78, %cst_43 {dimension_numbers = #tpu.dot_dimension_numbers<[1], [0], [0], [1], [0, 0, 1, 1], [], []>} : vector<16x8xbf16>, vector<8x32xbf16>, vector<16x32xf32> -> vector<16x32xf32>
    %80 = arith.addf %57, %79 : vector<16x32xf32>
    %81 = vector.extract_strided_slice %14 {offsets = [0, 0, 16], sizes = [2, 8, 8], strides = [1, 1, 1]} : vector<2x8x32xbf16> to vector<2x8x8xbf16>
    %82 = vector.extract_strided_slice %23 {offsets = [0, 0, 16], sizes = [2, 8, 8], strides = [1, 1, 1]} : vector<2x8x32xbf16> to vector<2x8x8xbf16>
    %83 = vector.extract_strided_slice %32 {offsets = [0, 0, 16], sizes = [2, 8, 8], strides = [1, 1, 1]} : vector<2x8x32xbf16> to vector<2x8x8xbf16>
    "tpu.trace_start"() <{level = 10 : i32, message = "bqd,bkd->bqk"}> : () -> ()
    %cst_44 = arith.constant dense<0.000000e+00> : vector<2x8x8xf32>
    %84 = tpu.matmul %81, %82, %cst_44 {dimension_numbers = #tpu.dot_dimension_numbers<[2], [2], [1], [1], [0, 0, 0, 1, 1, 1], [0], [0]>} : vector<2x8x8xbf16>, vector<2x8x8xbf16>, vector<2x8x8xf32> -> vector<2x8x8xf32>
    "tpu.trace_stop"() : () -> ()
    %cst_45 = arith.constant dense<0xFF800000> : vector<2x8xf32>
    %85 = vector.multi_reduction <maximumf>, %84, %cst_45 [2] : vector<2x8x8xf32> to vector<2x8xf32>
    %86 = vector.shape_cast %85 : vector<2x8xf32> to vector<2x8x1xf32>
    %87 = vector.broadcast %86 : vector<2x8x1xf32> to vector<2x8x8xf32>
    %88 = arith.subf %84, %87 : vector<2x8x8xf32>
    %89 = math.exp %88 : vector<2x8x8xf32>
    %cst_46 = arith.constant dense<0.000000e+00> : vector<2x8xf32>
    %90 = vector.multi_reduction <add>, %89, %cst_46 [2] : vector<2x8x8xf32> to vector<2x8xf32>
    %91 = vector.shape_cast %90 : vector<2x8xf32> to vector<2x8x1xf32>
    %92 = tpu.reciprocal %91 : vector<2x8x1xf32> -> vector<2x8x1xf32>
    %93 = vector.broadcast %92 : vector<2x8x1xf32> to vector<2x8x8xf32>
    %94 = arith.mulf %89, %93 : vector<2x8x8xf32>
    %95 = arith.addf %72, %94 : vector<2x8x8xf32>
    %96 = arith.truncf %94 : vector<2x8x8xf32> to vector<2x8x8xbf16>
    "tpu.trace_start"() <{level = 10 : i32, message = "bqk,bkd->bqd"}> : () -> ()
    %cst_47 = arith.constant dense<0.000000e+00> : vector<2x8x8xf32>
    %97 = tpu.matmul %96, %83, %cst_47 {dimension_numbers = #tpu.dot_dimension_numbers<[2], [1], [1], [2], [0, 0, 0, 1, 1, 2], [0], [0]>} : vector<2x8x8xbf16>, vector<2x8x8xbf16>, vector<2x8x8xf32> -> vector<2x8x8xf32>
    "tpu.trace_stop"() : () -> ()
    %98 = vector.shape_cast %97 : vector<2x8x8xf32> to vector<16x8xf32>
    %99 = arith.truncf %98 : vector<16x8xf32> to vector<16x8xbf16>
    %c0_48 = arith.constant 0 : index
    %c2 = arith.constant 2 : index
    %c0_49 = arith.constant 0 : index
    %c0_50 = arith.constant 0 : index
    %100 = vector.load %arg9[%c0_48, %c2, %c0_49, %c0_50] : memref<1x4x8x32xbf16, #tpu.memory_space<vmem>>, vector<1x1x8x32xbf16>
    %101 = vector.shape_cast %100 : vector<1x1x8x32xbf16> to vector<8x32xbf16>
    %cst_51 = arith.constant dense<0.000000e+00> : vector<16x32xf32>
    %102 = tpu.matmul %99, %101, %cst_51 {dimension_numbers = #tpu.dot_dimension_numbers<[1], [0], [0], [1], [0, 0, 1, 1], [], []>} : vector<16x8xbf16>, vector<8x32xbf16>, vector<16x32xf32> -> vector<16x32xf32>
    %103 = arith.addf %80, %102 : vector<16x32xf32>
    %104 = vector.extract_strided_slice %14 {offsets = [0, 0, 24], sizes = [2, 8, 8], strides = [1, 1, 1]} : vector<2x8x32xbf16> to vector<2x8x8xbf16>
    %105 = vector.extract_strided_slice %23 {offsets = [0, 0, 24], sizes = [2, 8, 8], strides = [1, 1, 1]} : vector<2x8x32xbf16> to vector<2x8x8xbf16>
    %106 = vector.extract_strided_slice %32 {offsets = [0, 0, 24], sizes = [2, 8, 8], strides = [1, 1, 1]} : vector<2x8x32xbf16> to vector<2x8x8xbf16>
    "tpu.trace_start"() <{level = 10 : i32, message = "bqd,bkd->bqk"}> : () -> ()
    %cst_52 = arith.constant dense<0.000000e+00> : vector<2x8x8xf32>
    %107 = tpu.matmul %104, %105, %cst_52 {dimension_numbers = #tpu.dot_dimension_numbers<[2], [2], [1], [1], [0, 0, 0, 1, 1, 1], [0], [0]>} : vector<2x8x8xbf16>, vector<2x8x8xbf16>, vector<2x8x8xf32> -> vector<2x8x8xf32>
    "tpu.trace_stop"() : () -> ()
    %cst_53 = arith.constant dense<0xFF800000> : vector<2x8xf32>
    %108 = vector.multi_reduction <maximumf>, %107, %cst_53 [2] : vector<2x8x8xf32> to vector<2x8xf32>
    %109 = vector.shape_cast %108 : vector<2x8xf32> to vector<2x8x1xf32>
    %110 = vector.broadcast %109 : vector<2x8x1xf32> to vector<2x8x8xf32>
    %111 = arith.subf %107, %110 : vector<2x8x8xf32>
    %112 = math.exp %111 : vector<2x8x8xf32>
    %cst_54 = arith.constant dense<0.000000e+00> : vector<2x8xf32>
    %113 = vector.multi_reduction <add>, %112, %cst_54 [2] : vector<2x8x8xf32> to vector<2x8xf32>
    %114 = vector.shape_cast %113 : vector<2x8xf32> to vector<2x8x1xf32>
    %115 = tpu.reciprocal %114 : vector<2x8x1xf32> -> vector<2x8x1xf32>
    %116 = vector.broadcast %115 : vector<2x8x1xf32> to vector<2x8x8xf32>
    %117 = arith.mulf %112, %116 : vector<2x8x8xf32>
    %118 = arith.addf %95, %117 : vector<2x8x8xf32>
    %119 = arith.truncf %117 : vector<2x8x8xf32> to vector<2x8x8xbf16>
    "tpu.trace_start"() <{level = 10 : i32, message = "bqk,bkd->bqd"}> : () -> ()
    %cst_55 = arith.constant dense<0.000000e+00> : vector<2x8x8xf32>
    %120 = tpu.matmul %119, %106, %cst_55 {dimension_numbers = #tpu.dot_dimension_numbers<[2], [1], [1], [2], [0, 0, 0, 1, 1, 2], [0], [0]>} : vector<2x8x8xbf16>, vector<2x8x8xbf16>, vector<2x8x8xf32> -> vector<2x8x8xf32>
    "tpu.trace_stop"() : () -> ()
    %121 = vector.shape_cast %120 : vector<2x8x8xf32> to vector<16x8xf32>
    %122 = arith.truncf %121 : vector<16x8xf32> to vector<16x8xbf16>
    %c0_56 = arith.constant 0 : index
    %c3 = arith.constant 3 : index
    %c0_57 = arith.constant 0 : index
    %c0_58 = arith.constant 0 : index
    %123 = vector.load %arg9[%c0_56, %c3, %c0_57, %c0_58] : memref<1x4x8x32xbf16, #tpu.memory_space<vmem>>, vector<1x1x8x32xbf16>
    %124 = vector.shape_cast %123 : vector<1x1x8x32xbf16> to vector<8x32xbf16>
    %cst_59 = arith.constant dense<0.000000e+00> : vector<16x32xf32>
    %125 = tpu.matmul %122, %124, %cst_59 {dimension_numbers = #tpu.dot_dimension_numbers<[1], [0], [0], [1], [0, 0, 1, 1], [], []>} : vector<16x8xbf16>, vector<8x32xbf16>, vector<16x32xf32> -> vector<16x32xf32>
    %126 = arith.addf %103, %125 : vector<16x32xf32>
    %c0_60 = arith.constant 0 : index
    %c0_61 = arith.constant 0 : index
    %c0_62 = arith.constant 0 : index
    %127 = vector.load %arg10[%c0_60, %c0_61, %c0_62] : memref<1x1x32xf32, #tpu.memory_space<vmem>>, vector<1x1x32xf32>
    %128 = vector.shape_cast %127 : vector<1x1x32xf32> to vector<1x32xf32>
    %129 = vector.broadcast %128 : vector<1x32xf32> to vector<16x32xf32>
    %130 = arith.addf %126, %129 : vector<16x32xf32>
    %cst_63 = arith.constant 2.500000e-01 : f32
    %131 = vector.broadcast %cst_63 : f32 to vector<2x8x8xf32>
    %132 = arith.mulf %118, %131 : vector<2x8x8xf32>
    %c0_64 = arith.constant 0 : index
    %c0_65 = arith.constant 0 : index
    %c0_66 = arith.constant 0 : index
    %c0_67 = arith.constant 0 : index
    %133 = vector.load %arg20[%c0_64, %c0_65, %c0_66, %c0_67] : memref<1x2x8x8xf32, #tpu.memory_space<vmem>>, vector<1x2x8x8xf32>
    %134 = vector.shape_cast %133 : vector<1x2x8x8xf32> to vector<2x8x8xf32>
    %135 = vector.shape_cast %132 : vector<2x8x8xf32> to vector<1x2x8x8xf32>
    tpu.vector_store %arg20[%c0_64, %c0_65, %c0_66, %c0_67], %135 {strides = array<i32>} : memref<1x2x8x8xf32, #tpu.memory_space<vmem>>, vector<1x2x8x8xf32>,
    %136 = arith.addf %4, %130 : vector<16x32xf32>
    %c0_68 = arith.constant 0 : index
    %c0_69 = arith.constant 0 : index
    %c0_70 = arith.constant 0 : index
    %137 = vector.load %arg15[%c0_68, %c0_69, %c0_70] : memref<1x1x32xf32, #tpu.memory_space<vmem>>, vector<1x1x32xf32>
    %138 = vector.shape_cast %137 : vector<1x1x32xf32> to vector<1x32xf32>
    %c0_71 = arith.constant 0 : index
    %c0_72 = arith.constant 0 : index
    %c0_73 = arith.constant 0 : index
    %139 = vector.load %arg16[%c0_71, %c0_72, %c0_73] : memref<1x1x32xf32, #tpu.memory_space<vmem>>, vector<1x1x32xf32>
    %140 = vector.shape_cast %139 : vector<1x1x32xf32> to vector<1x32xf32>
    %cst_74 = arith.constant dense<0.000000e+00> : vector<16xf32>
    %141 = vector.multi_reduction <add>, %136, %cst_74 [1] : vector<16x32xf32> to vector<16xf32>
    %142 = vector.shape_cast %141 : vector<16xf32> to vector<16x1xf32>
    %cst_75 = arith.constant 3.200000e+01 : f32
    %143 = vector.broadcast %cst_75 : f32 to vector<16x1xf32>
    %144 = arith.divf %142, %143 : vector<16x1xf32>
    %145 = vector.broadcast %144 : vector<16x1xf32> to vector<16x32xf32>
    %146 = arith.subf %136, %145 : vector<16x32xf32>
    %147 = arith.mulf %146, %146 : vector<16x32xf32>
    %cst_76 = arith.constant dense<0.000000e+00> : vector<16xf32>
    %148 = vector.multi_reduction <add>, %147, %cst_76 [1] : vector<16x32xf32> to vector<16xf32>
    %149 = vector.shape_cast %148 : vector<16xf32> to vector<16x1xf32>
    %cst_77 = arith.constant 3.200000e+01 : f32
    %150 = vector.broadcast %cst_77 : f32 to vector<16x1xf32>
    %151 = arith.divf %149, %150 : vector<16x1xf32>
    %152 = vector.broadcast %144 : vector<16x1xf32> to vector<16x32xf32>
    %153 = arith.subf %136, %152 : vector<16x32xf32>
    %cst_78 = arith.constant 9.99999974E-6 : f32
    %154 = vector.broadcast %cst_78 : f32 to vector<16x1xf32>
    %155 = arith.addf %151, %154 : vector<16x1xf32>
    %156 = math.rsqrt %155 : vector<16x1xf32>
    %157 = vector.broadcast %156 : vector<16x1xf32> to vector<16x32xf32>
    %158 = arith.mulf %153, %157 : vector<16x32xf32>
    %159 = vector.broadcast %138 : vector<1x32xf32> to vector<16x32xf32>
    %160 = arith.mulf %158, %159 : vector<16x32xf32>
    %161 = vector.broadcast %140 : vector<1x32xf32> to vector<16x32xf32>
    %162 = arith.addf %160, %161 : vector<16x32xf32>
    %163 = arith.truncf %162 : vector<16x32xf32> to vector<16x32xbf16>
    %cst_79 = arith.constant 0.000000e+00 : f32
    %164 = vector.broadcast %cst_79 : f32 to vector<16x32xf32>
    %c0_80 = arith.constant 0 : index
    %c0_81 = arith.constant 0 : index
    %c0_82 = arith.constant 0 : index
    %c0_83 = arith.constant 0 : index
    %165 = vector.load %arg11[%c0_80, %c0_81, %c0_82, %c0_83] : memref<1x1x32x64xbf16, #tpu.memory_space<vmem>>, vector<1x1x32x64xbf16>
    %166 = vector.shape_cast %165 : vector<1x1x32x64xbf16> to vector<32x64xbf16>
    %cst_84 = arith.constant dense<0.000000e+00> : vector<16x64xf32>
    %167 = tpu.matmul %163, %166, %cst_84 {dimension_numbers = #tpu.dot_dimension_numbers<[1], [0], [0], [1], [0, 0, 1, 1], [], []>} : vector<16x32xbf16>, vector<32x64xbf16>, vector<16x64xf32> -> vector<16x64xf32>
    %c0_85 = arith.constant 0 : index
    %c0_86 = arith.constant 0 : index
    %c0_87 = arith.constant 0 : index
    %c0_88 = arith.constant 0 : index
    %168 = vector.load %arg12[%c0_85, %c0_86, %c0_87, %c0_88] : memref<1x1x1x64xf32, #tpu.memory_space<vmem>>, vector<1x1x1x64xf32>
    %169 = vector.shape_cast %168 : vector<1x1x1x64xf32> to vector<1x64xf32>
    %170 = vector.broadcast %169 : vector<1x64xf32> to vector<16x64xf32>
    %171 = arith.addf %167, %170 : vector<16x64xf32>
    %cst_89 = arith.constant 0.000000e+00 : f32
    %172 = vector.broadcast %cst_89 : f32 to vector<16x64xf32>
    %173 = arith.maximumf %171, %172 : vector<16x64xf32>
    %174 = arith.truncf %173 : vector<16x64xf32> to vector<16x64xbf16>
    %c0_90 = arith.constant 0 : index
    %c0_91 = arith.constant 0 : index
    %c0_92 = arith.constant 0 : index
    %c0_93 = arith.constant 0 : index
    %175 = vector.load %arg13[%c0_90, %c0_91, %c0_92, %c0_93] : memref<1x1x64x32xbf16, #tpu.memory_space<vmem>>, vector<1x1x64x32xbf16>
    %176 = vector.shape_cast %175 : vector<1x1x64x32xbf16> to vector<64x32xbf16>
    %cst_94 = arith.constant dense<0.000000e+00> : vector<16x32xf32>
    %177 = tpu.matmul %174, %176, %cst_94 {dimension_numbers = #tpu.dot_dimension_numbers<[1], [0], [0], [1], [0, 0, 1, 1], [], []>} : vector<16x64xbf16>, vector<64x32xbf16>, vector<16x32xf32> -> vector<16x32xf32>
    %178 = arith.addf %164, %177 : vector<16x32xf32>
    %c0_95 = arith.constant 0 : index
    %c0_96 = arith.constant 0 : index
    %c0_97 = arith.constant 0 : index
    %179 = vector.load %arg14[%c0_95, %c0_96, %c0_97] : memref<1x1x32xf32, #tpu.memory_space<vmem>>, vector<1x1x32xf32>
    %180 = vector.shape_cast %179 : vector<1x1x32xf32> to vector<1x32xf32>
    %181 = vector.broadcast %180 : vector<1x32xf32> to vector<16x32xf32>
    %182 = arith.addf %178, %181 : vector<16x32xf32>
    %183 = arith.addf %162, %182 : vector<16x32xf32>
    %c0_98 = arith.constant 0 : index
    %c0_99 = arith.constant 0 : index
    %c0_100 = arith.constant 0 : index
    %184 = vector.load %arg17[%c0_98, %c0_99, %c0_100] : memref<1x1x32xf32, #tpu.memory_space<vmem>>, vector<1x1x32xf32>
    %185 = vector.shape_cast %184 : vector<1x1x32xf32> to vector<1x32xf32>
    %c0_101 = arith.constant 0 : index
    %c0_102 = arith.constant 0 : index
    %c0_103 = arith.constant 0 : index
    %186 = vector.load %arg18[%c0_101, %c0_102, %c0_103] : memref<1x1x32xf32, #tpu.memory_space<vmem>>, vector<1x1x32xf32>
    %187 = vector.shape_cast %186 : vector<1x1x32xf32> to vector<1x32xf32>
    %cst_104 = arith.constant dense<0.000000e+00> : vector<16xf32>
    %188 = vector.multi_reduction <add>, %183, %cst_104 [1] : vector<16x32xf32> to vector<16xf32>
    %189 = vector.shape_cast %188 : vector<16xf32> to vector<16x1xf32>
    %cst_105 = arith.constant 3.200000e+01 : f32
    %190 = vector.broadcast %cst_105 : f32 to vector<16x1xf32>
    %191 = arith.divf %189, %190 : vector<16x1xf32>
    %192 = vector.broadcast %191 : vector<16x1xf32> to vector<16x32xf32>
    %193 = arith.subf %183, %192 : vector<16x32xf32>
    %194 = arith.mulf %193, %193 : vector<16x32xf32>
    %cst_106 = arith.constant dense<0.000000e+00> : vector<16xf32>
    %195 = vector.multi_reduction <add>, %194, %cst_106 [1] : vector<16x32xf32> to vector<16xf32>
    %196 = vector.shape_cast %195 : vector<16xf32> to vector<16x1xf32>
    %cst_107 = arith.constant 3.200000e+01 : f32
    %197 = vector.broadcast %cst_107 : f32 to vector<16x1xf32>
    %198 = arith.divf %196, %197 : vector<16x1xf32>
    %199 = vector.broadcast %191 : vector<16x1xf32> to vector<16x32xf32>
    %200 = arith.subf %183, %199 : vector<16x32xf32>
    %cst_108 = arith.constant 9.99999974E-6 : f32
    %201 = vector.broadcast %cst_108 : f32 to vector<16x1xf32>
    %202 = arith.addf %198, %201 : vector<16x1xf32>
    %203 = math.rsqrt %202 : vector<16x1xf32>
    %204 = vector.broadcast %203 : vector<16x1xf32> to vector<16x32xf32>
    %205 = arith.mulf %200, %204 : vector<16x32xf32>
    %206 = vector.broadcast %185 : vector<1x32xf32> to vector<16x32xf32>
    %207 = arith.mulf %205, %206 : vector<16x32xf32>
    %208 = vector.broadcast %187 : vector<1x32xf32> to vector<16x32xf32>
    %209 = arith.addf %207, %208 : vector<16x32xf32>
    %210 = vector.shape_cast %209 : vector<16x32xf32> to vector<2x8x32xf32>
    %c1_i32 = arith.constant 1 : i32
    %211 = arith.cmpi slt, %arg1, %c1_i32 : i32
    %212 = arith.extui %211 : i1 to i32
    %c0_i32_109 = arith.constant 0 : i32
    %213 = arith.cmpi ne, %212, %c0_i32_109 : i32
    scf.if %213 {
      %c0_112 = arith.constant 0 : index
      %c0_113 = arith.constant 0 : index
      %c0_114 = arith.constant 0 : index
      %217 = vector.load %arg21[%c0_112, %c0_113, %c0_114] : memref<2x8x32xf32, #tpu.memory_space<vmem>>, vector<2x8x32xf32>
      tpu.vector_store %arg21[%c0_112, %c0_113, %c0_114], %210 {strides = array<i32>} : memref<2x8x32xf32, #tpu.memory_space<vmem>>, vector<2x8x32xf32>,
    } else {
    }
    %c1_i32_110 = arith.constant 1 : i32
    %214 = arith.cmpi eq, %arg1, %c1_i32_110 : i32
    %215 = arith.extui %214 : i1 to i32
    %c0_i32_111 = arith.constant 0 : i32
    %216 = arith.cmpi ne, %215, %c0_i32_111 : i32
    scf.if %216 {
      %c0_112 = arith.constant 0 : index
      %c0_113 = arith.constant 0 : index
      %c0_114 = arith.constant 0 : index
      %217 = vector.load %arg19[%c0_112, %c0_113, %c0_114] : memref<2x8x32xf32, #tpu.memory_space<vmem>>, vector<2x8x32xf32>
      tpu.vector_store %arg19[%c0_112, %c0_113, %c0_114], %210 {strides = array<i32>} : memref<2x8x32xf32, #tpu.memory_space<vmem>>, vector<2x8x32xf32>,
    } else {
    }
    return
  }
  func.func @transform_0(%arg0: i32, %arg1: i32) -> (i32, i32, i32) {
    %c0_i32 = arith.constant 0 : i32
    %c0_i32_0 = arith.constant 0 : i32
    %c0_i32_1 = arith.constant 0 : i32
    return %arg0, %c0_i32, %c0_i32_0 : i32, i32, i32
  }
  func.func @transform_1(%arg0: i32, %arg1: i32) -> (i32, i32, i32) {
    %c0_i32 = arith.constant 0 : i32
    %c0_i32_0 = arith.constant 0 : i32
    %c0_i32_1 = arith.constant 0 : i32
    return %arg1, %c0_i32, %c0_i32_0 : i32, i32, i32
  }
  func.func @transform_2(%arg0: i32, %arg1: i32) -> (i32, i32, i32) {
    %c0_i32 = arith.constant 0 : i32
    %c0_i32_0 = arith.constant 0 : i32
    %c0_i32_1 = arith.constant 0 : i32
    return %arg1, %c0_i32, %c0_i32_0 : i32, i32, i32
  }
  func.func @transform_3(%arg0: i32, %arg1: i32) -> (i32, i32, i32) {
    %c0_i32 = arith.constant 0 : i32
    %c0_i32_0 = arith.constant 0 : i32
    %c0_i32_1 = arith.constant 0 : i32
    return %arg1, %c0_i32, %c0_i32_0 : i32, i32, i32
  }
  func.func @transform_4(%arg0: i32, %arg1: i32) -> (i32, i32, i32) {
    %c0_i32 = arith.constant 0 : i32
    %c0_i32_0 = arith.constant 0 : i32
    %c0_i32_1 = arith.constant 0 : i32
    return %arg1, %c0_i32, %c0_i32_0 : i32, i32, i32
  }
  func.func @transform_5(%arg0: i32, %arg1: i32) -> (i32, i32, i32) {
    %c0_i32 = arith.constant 0 : i32
    %c0_i32_0 = arith.constant 0 : i32
    %c0_i32_1 = arith.constant 0 : i32
    return %arg1, %c0_i32, %c0_i32_0 : i32, i32, i32
  }
  func.func @transform_6(%arg0: i32, %arg1: i32) -> (i32, i32, i32) {
    %c0_i32 = arith.constant 0 : i32
    %c0_i32_0 = arith.constant 0 : i32
    %c0_i32_1 = arith.constant 0 : i32
    return %arg1, %c0_i32, %c0_i32_0 : i32, i32, i32
  }
  func.func @transform_7(%arg0: i32, %arg1: i32) -> (i32, i32, i32, i32) {
    %c0_i32 = arith.constant 0 : i32
    %c0_i32_0 = arith.constant 0 : i32
    %c0_i32_1 = arith.constant 0 : i32
    %c0_i32_2 = arith.constant 0 : i32
    return %arg1, %c0_i32, %c0_i32_0, %c0_i32_1 : i32, i32, i32, i32
  }
  func.func @transform_8(%arg0: i32, %arg1: i32) -> (i32, i32, i32) {
    %c0_i32 = arith.constant 0 : i32
    %c0_i32_0 = arith.constant 0 : i32
    %c0_i32_1 = arith.constant 0 : i32
    return %arg1, %c0_i32, %c0_i32_0 : i32, i32, i32
  }
  func.func @transform_9(%arg0: i32, %arg1: i32) -> (i32, i32, i32, i32) {
    %c0_i32 = arith.constant 0 : i32
    %c0_i32_0 = arith.constant 0 : i32
    %c0_i32_1 = arith.constant 0 : i32
    %c0_i32_2 = arith.constant 0 : i32
    return %arg1, %c0_i32, %c0_i32_0, %c0_i32_1 : i32, i32, i32, i32
  }
  func.func @transform_10(%arg0: i32, %arg1: i32) -> (i32, i32, i32, i32) {
    %c0_i32 = arith.constant 0 : i32
    %c0_i32_0 = arith.constant 0 : i32
    %c0_i32_1 = arith.constant 0 : i32
    %c0_i32_2 = arith.constant 0 : i32
    return %arg1, %c0_i32, %c0_i32_0, %c0_i32_1 : i32, i32, i32, i32
  }
  func.func @transform_11(%arg0: i32, %arg1: i32) -> (i32, i32, i32, i32) {
    %c0_i32 = arith.constant 0 : i32
    %c0_i32_0 = arith.constant 0 : i32
    %c0_i32_1 = arith.constant 0 : i32
    %c0_i32_2 = arith.constant 0 : i32
    return %arg1, %c0_i32, %c0_i32_0, %c0_i32_1 : i32, i32, i32, i32
  }
  func.func @transform_12(%arg0: i32, %arg1: i32) -> (i32, i32, i32) {
    %c0_i32 = arith.constant 0 : i32
    %c0_i32_0 = arith.constant 0 : i32
    %c0_i32_1 = arith.constant 0 : i32
    return %arg1, %c0_i32, %c0_i32_0 : i32, i32, i32
  }
  func.func @transform_13(%arg0: i32, %arg1: i32) -> (i32, i32, i32) {
    %c0_i32 = arith.constant 0 : i32
    %c0_i32_0 = arith.constant 0 : i32
    %c0_i32_1 = arith.constant 0 : i32
    return %arg1, %c0_i32, %c0_i32_0 : i32, i32, i32
  }
  func.func @transform_14(%arg0: i32, %arg1: i32) -> (i32, i32, i32) {
    %c0_i32 = arith.constant 0 : i32
    %c0_i32_0 = arith.constant 0 : i32
    %c0_i32_1 = arith.constant 0 : i32
    return %arg1, %c0_i32, %c0_i32_0 : i32, i32, i32
  }
  func.func @transform_15(%arg0: i32, %arg1: i32) -> (i32, i32, i32) {
    %c0_i32 = arith.constant 0 : i32
    %c0_i32_0 = arith.constant 0 : i32
    %c0_i32_1 = arith.constant 0 : i32
    return %arg1, %c0_i32, %c0_i32_0 : i32, i32, i32
  }
  func.func @transform_16(%arg0: i32, %arg1: i32) -> (i32, i32, i32) {
    %c0_i32 = arith.constant 0 : i32
    %c0_i32_0 = arith.constant 0 : i32
    %c0_i32_1 = arith.constant 0 : i32
    return %arg1, %c0_i32, %c0_i32_0 : i32, i32, i32
  }
  func.func @transform_17(%arg0: i32, %arg1: i32) -> (i32, i32, i32) {
    %c0_i32 = arith.constant 0 : i32
    %c0_i32_0 = arith.constant 0 : i32
    %c0_i32_1 = arith.constant 0 : i32
    return %arg0, %c0_i32, %c0_i32_0 : i32, i32, i32
  }
  func.func @transform_18(%arg0: i32, %arg1: i32) -> (i32, i32, i32, i32) {
    %c0_i32 = arith.constant 0 : i32
    %c0_i32_0 = arith.constant 0 : i32
    %c0_i32_1 = arith.constant 0 : i32
    return %arg1, %arg0, %c0_i32, %c0_i32_0 : i32, i32, i32, i32
  }
}

</mosaic_0001>

<bundles_post_ra>
// kernel: tpu_custom_call.1
= control target key start
LH: loop header
LB: loop body
LE: loop exit
PB: predicated region body
PF: predicated region fallthrough
CT: control target
= control target key end

     0   :  { %s4323_s0 = inlined_call_operand.hbm [shape: f32[2,8,32], index: 0, kind: input, shape index: {}]   ;;  %s4324_s1 = inlined_call_operand.vmem [shape: bf16[2,32,32], index: 1, kind: input, shape index: {}]   ;;  %s4325_s2 = inlined_call_operand.vmem [shape: bf16[2,32,32], index: 2, kind: input, shape index: {}]   ;;  %s4326_s3 = inlined_call_operand.vmem [shape: bf16[2,32,32], index: 3, kind: input, shape index: {}]   ;;  %s4327_s4 = inlined_call_operand.vmem [shape: f32[2,1,32], index: 4, kind: input, shape index: {}]   ;;  %s4328_s5 = inlined_call_operand.vmem [shape: f32[2,1,32], index: 5, kind: input, shape index: {}]   ;;  %s4329_s6 = inlined_call_operand.vmem [shape: f32[2,1,32], index: 6, kind: input, shape index: {}]   ;;  %s4330_s7 = inlined_call_operand.hbm [shape: bf16[2,4,8,32], index: 7, kind: input, shape index: {}]   ;;  %s4331_s8 = inlined_call_operand.vmem [shape: f32[2,1,32], index: 8, kind: input, shape index: {}]   ;;  %s4332_s9 = inlined_call_operand.hbm [shape: bf16[2,1,32,64], index: 9, kind: input, shape index: {}]   ;;  %s4333_s10 = inlined_call_operand.hbm [shape: f32[2,1,1,64], index: 10, kind: input, shape index: {}]   ;;  %s4334_s11 = inlined_call_operand.vmem [shape: bf16[2,1,64,32], index: 11, kind: input, shape index: {}]   ;;  %s4335_s12 = inlined_call_operand.vmem [shape: f32[2,1,32], index: 12, kind: input, shape index: {}]   ;;  %s4336_s13 = inlined_call_operand.vmem [shape: f32[2,1,32], index: 13, kind: input, shape index: {}]   ;;  %s4337_s14 = inlined_call_operand.vmem [shape: f32[2,1,32], index: 14, kind: input, shape index: {}]   ;;  %s4338_s15 = inlined_call_operand.vmem [shape: f32[2,1,32], index: 15, kind: input, shape index: {}]   ;;  %s4339_s16 = inlined_call_operand.vmem [shape: f32[2,1,32], index: 16, kind: input, shape index: {}]   ;;  %s4340_s17 = inlined_call_operand.hbm [shape: f32[2,8,32], index: 17, kind: output, shape index: {0}]   ;;  %s4341_s18 = inlined_call_operand.hbm [shape: f32[2,2,8,8], index: 18, kind: output, shape index: {1}]  }
   0x1   :  { %4367 = sst [smem:[#allocation26_spill]] %s4323_s0 }
   0x2   :  { %4368 = sst [smem:[#allocation27_spill]] %s4324_s1 }
   0x3   :  { %4369 = sst [smem:[#allocation28_spill]] %s4325_s2 }
   0x4   :  { %4370 = sst [smem:[#allocation29_spill]] %s4330_s7 }
   0x5   :  { %4371 = sst [smem:[#allocation30_spill]] %s4331_s8 }
   0x6   :  { %4372 = sst [smem:[#allocation31_spill]] %s4332_s9 }
   0x7   :  { %4373 = sst [smem:[#allocation32_spill]] %s4334_s11 }
   0x8   :  { %4374 = sst [smem:[#allocation33_spill]] %s4335_s12 }
   0x9   :  { %4375 = sst [smem:[#allocation34_spill]] %s4336_s13 }
   0xa   :  { %4376 = sst [smem:[#allocation35_spill]] %s4337_s14 }
   0xb   :  { %4377 = sst [smem:[#allocation36_spill]] %s4338_s15 }
   0xc   :  { %4378 = sst [smem:[#allocation37_spill]] %s4339_s16 }
   0xd   :  { %4379 = sst [smem:[#allocation38_spill]] %s4340_s17 }
   0xe   :  { %4380 = sst [smem:[#allocation39_spill]] %s4341_s18 }
   0xf   :  { %24 = vsyncpa [#allocation4], 0 }
  0x10   :  { %25 = vsyncpa [#allocation7], 0 }
  0x11   :  { %27 = vsyncpa [#allocation7 + $0x1], 0 }
  0x12   :  { %28 = vsyncpa [#allocation10], 0 }
  0x13   :  { %30 = vsyncpa [#allocation10 + $0x1], 0 }
  0x14   :  { %31 = vsyncpa [#allocation5], 0 }
  0x15   :  { %32 = vsyncpa [#allocation13], 0 }
  0x16   :  { %34 = vsyncpa [#allocation13 + $0x1], 0  ;;  %s3638_s27 = smov 0   ;;  %s3640_s28 = smov 0  }
  0x17   :  { %s3642_s29 = smov 0   ;;  %s3644_s30 = smov 0  }
  0x18   :  { %s3646_s0 = smov 0   ;;  %s3648_s19 = smov 0  }
  0x19 LB: > { %4381 = sst [smem:[#allocation19_spill]] %s3504_s27  ;;  %s49_s1 = sadd.s32 1, %s3520_s0  ;;  %s3524_s19 = sphi %s3648_s19, %s40_s19   ;;  %s3520_s0 = sphi %s3646_s0, %s4442_s0   ;;  %s3516_s30 = sphi %s3644_s30, %s4441_s30   ;;  %s3512_s29 = sphi %s3642_s29, %s4437_s29   ;;  %s3508_s28 = sphi %s3640_s28, %s4440_s28   ;;  %s3504_s27 = sphi %s3638_s27, %s4439_s27  }
  0x1a   : > { %4382 = sst [smem:[#allocation20_spill]] %s3512_s29  ;;  %s241_s20 = sadd.s32 1, %s3512_s29 }
  0x1b   : > { %4383 = sst [smem:[#allocation21_spill]] %s3524_s19  ;;  %p50_p0 = scmp.ge.s32.totalorder %s49_s1, 2 }
  0x1c   : > { %p4348_p1 = scmp.ne.s32.totalorder %s3512_s29, %s3508_s28  ;;  %p249_p2 = scmp.eq.s32.totalorder %s3524_s19, 0 }
  0x1d   : > { %s4444_s1 = smov (%p50_p0, %s49_s1), 0  ;;  %p3168_p5 = scmp.lt.s32.totalorder %s3524_s19, 2 }
  0x1e   : > { %4384 = sst [smem:[#allocation22_spill]] %s4444_s1  ;;  %p250_p4 = por %p249_p2, %p4348_p1 }
  0x1f   : > { %s238_s21 = ssub.s32 %s3520_s0, %s4444_s1  ;;  %s624_s22 = sand.u32 1, %s3524_s19  }
  0x20   : > { %p239_p6 = scmp.eq.s32.totalorder %s238_s21, 0  ;;  %s3684_s2 = sand.u32 1, %s3512_s29  }
  0x21   : > { %s4346_s23 = sshll.u32 %s3520_s0, 8  ;;  %s4347_s25 = sshll.u32 %s3684_s2, 4 }
  0x22   : > { %s3688_s24 = scalar_select %p239_p6, %s3512_s29, %s241_s20  }
  0x23   : > { %s4386_s7 = sld [smem:[#allocation29_spill]]  ;;  %p3698_p7 = pnand %p3168_p5, %p250_p4 }
  0x24   : > { %4385 = sst [smem:[#allocation23_spill]] %s3688_s24  ;;  %s628_s1 = scalar_lea.vmem [#allocation6], %s4347_s25 }
  0x25   : > { %s4387_s21 = scalar_select %p3698_p7, 1, 0 }
  0x26   : > { %s635_s20 = sshll.u32 %s628_s1, 4  ;;  %s3706_s24 = scalar_lea.sflag [#allocation7], %s624_s22  ;;  %s3704_s20 = int_to_ptr.vmem [resolvable:$true] %s635_s20 }
  0x27   : > { %p3712_p9 = pneg %p3698_p7 }
  0x29   : > { %s3696_s17 = scalar_lea.hbm %s4386_s7, %s4346_s23  ;;  %s3291_s25 = scalar_lea.hbm %s4386_s7, 512 }
  0x2a   : > { %s3286_s16 = scalar_lea.hbm %s3696_s17, 256  ;;  %p3292_p12 = scmp.lt.u32.totalorder %s3696_s17, %s4386_s7 }
  0x2b   : > { %p3287_p8 = scmp.ne.s32.totalorder %s3696_s17, %s3286_s16  ;;  %p3293_p13 = scmp.lt.u32.totalorder %s3291_s25, %s3286_s16 }
  0x2c   : > { %s4388_s18 = scalar_select %p3712_p9, 1, 0 }
  0x2d   : > { %p3289_p10 = pnand %p3712_p9, %p3287_p8  ;;  %p3294_p0 = por %p3293_p13, %p3292_p12 }
  0x2e   : > { %p3295_p2 = scmp.lt.u32.totalorder %s3286_s16, %s3696_s17 }
  0x2f   : > { %p3290_p11 = pneg %p3289_p10 }
  0x30   : > { %p3296_p4 = por %p3295_p2, %p3294_p0 }
  0x32   : > { %p3297_p5 = pnand %p3296_p4, %p3290_p11 }
  0x34   : > { %3300 = shalt.err (!%p3297_p5)
}
  0x35   : > { %s3301_s22 = scalar_lea.vmem %s3704_s20, 256  ;;  %s3526_s23 = smov [#allocation6]  }
  0x36   : > { %p3302_p6 = scmp.ne.s32.totalorder %s3704_s20, %s3301_s22  ;;  %s3306_s26 = sshll.u32 %s3526_s23, 4  ;;  %s3307_s26 = int_to_ptr.vmem [resolvable:$false] %s3306_s26 }
  0x37   : > { %s3308_s15 = scalar_lea.vmem %s3307_s26, 512  ;;  %p3309_p3 = scmp.lt.s32.totalorder %s3704_s20, %s3307_s26 }
  0x38   : > { %p3304_p8 = pnand %p3302_p6, %p3712_p9  ;;  %p3310_p1 = scmp.lt.s32.totalorder %s3308_s15, %s3301_s22 }
  0x3a   : > { %p3305_p10 = pneg %p3304_p8  ;;  %p3311_p12 = por %p3310_p1, %p3309_p3 }
  0x3c   : > { %p3312_p13 = pnand %p3311_p12, %p3305_p10 }
  0x3e   : > { %3315 = shalt.err (!%p3312_p13)
}
  0x3f   : > { %s4350_s16 = smov 64   ;;  %s4351_s25 = smov 4  }
  0x40   : > { %3156 = dma.hbm_to_vmem [thread:$0]  (!%p3698_p7), %s3696_s17, 256, %s3704_s20, %s3706_s24, %s4350_s16, %s4350_s16, %s4351_s25  }
  0x41   : > { %s4389_s1 = sshll.u32 %s3520_s0, 8  ;;  %s4390_s9 = sld [smem:[#allocation31_spill]] }
  0x42   : > { %s4391_s15 = sshll.u32 %s3684_s2, 4  ;;  %s3751_s14 = sadd.s32 4294967295, %s3524_s19  }
  0x43   : > { %s655_s7 = scalar_lea.vmem [#allocation8], %s4391_s15  ;;  %s2810_s13 = sadd.s32 4294967294, %s3524_s19  }
  0x44   : > { %s662_s12 = sshll.u32 %s655_s7, 4  ;;  %p254_p1 = scmp.ne.s32.totalorder %s3508_s28, %s3504_s27  ;;  %s3748_s12 = int_to_ptr.vmem [resolvable:$true] %s662_s12 }
  0x45   : > { %p4355_p3 = scmp.eq.s32.totalorder %s3751_s14, 0  ;;  %p4349_p11 = scmp.eq.s32.totalorder %s3751_s14, 1 }
  0x46   : > { %p546_p0 = scmp.eq.s32.totalorder %s2810_s13, 1  ;;  %p2811_p2 = scmp.ge.s32.totalorder %s3524_s19, 1 }
  0x47   : > { %s3744_s26 = scalar_lea.hbm %s4390_s9, %s4389_s1  ;;  %p3761_p4 = por %p4355_p3, %p254_p1 }
  0x48   : > { %p4393_p5 = scmp.ne.s32.totalorder %s3512_s29, %s3508_s28  ;;  %p3774_p8 = por %p546_p0, %p254_p1 }
  0x49   : > { %s4392_s7 = scalar_select %p3761_p4, 1, 0 }
  0x4a   : > { %p3770_p6 = por %p4349_p11, %p4393_p5  ;;  %p553_p10 = scmp.lt.s32.totalorder %s3524_s19, 3 }
  0x4b   : > { %s4396_s20 = scalar_select %p3774_p8, 1, 0 }
  0x4c   : > { %s4394_s17 = scalar_select %p3770_p6, 1, 0 }
  0x4d   : > { %4397 = sst [smem:[#allocation25_spill]] %s4396_s20  ;;  %p3779_p12 = pnand %p2811_p2, %p553_p10 }
  0x4e   : > { %4395 = sst [smem:[#allocation24_spill]] %s4394_s17  ;;  %s3529_s1 = smov [#allocation3]  }
  0x4f   : > { %s4398_s13 = scalar_select %p3779_p12, 1, 0 }
  0x50   : > { %s568_s22 = sshll.u32 %s3529_s1, 4  ;;  %s3316_s23 = scalar_lea.hbm %s3744_s26, 256  ;;  %s3783_s22 = int_to_ptr.vmem [resolvable:$true] %s568_s22 }
  0x51   : > { %p3317_p5 = scmp.ne.s32.totalorder %s3744_s26, %s3316_s23  ;;  %s3321_s25 = scalar_lea.hbm %s4390_s9, 512 }
  0x52   : > { %p3322_p0 = scmp.lt.u32.totalorder %s3744_s26, %s4390_s9  ;;  %p3323_p2 = scmp.lt.u32.totalorder %s3321_s25, %s3316_s23 }
  0x53   : > { %p3319_p11 = pnand %p3317_p5, %p3712_p9  ;;  %p3325_p3 = scmp.lt.u32.totalorder %s3316_s23, %s3744_s26 }
  0x54   : > { %p3324_p10 = por %p3323_p2, %p3322_p0 }
  0x55   : > { %p3320_p1 = pneg %p3319_p11 }
  0x56   : > { %p3326_p8 = por %p3325_p3, %p3324_p10 }
  0x58   : > { %p3327_p6 = pnand %p3326_p8, %p3320_p1 }
  0x5a   : > { %3330 = shalt.err (!%p3327_p6)
}
  0x5b   : > { %s3331_s1 = scalar_lea.vmem %s3748_s12, 256  ;;  %s3530_s16 = smov [#allocation8]  }
  0x5c   : > { %p3332_p11 = scmp.ne.s32.totalorder %s3748_s12, %s3331_s1  ;;  %s3336_s15 = sshll.u32 %s3530_s16, 4  ;;  %s3337_s15 = int_to_ptr.vmem [resolvable:$false] %s3336_s15 }
  0x5d   : > { %s3338_s29 = scalar_lea.vmem %s3337_s15, 512  ;;  %p3339_p4 = scmp.lt.s32.totalorder %s3748_s12, %s3337_s15 }
  0x5e   : > { %p3334_p5 = pnand %p3332_p11, %p3712_p9  ;;  %p3340_p12 = scmp.lt.s32.totalorder %s3338_s29, %s3331_s1 }
  0x60   : > { %p3335_p13 = pneg %p3334_p5  ;;  %p3341_p0 = por %p3340_p12, %p3339_p4 }
  0x62   : > { %p3342_p2 = pnand %p3341_p0, %p3335_p13 }
  0x64   : > { %3345 = shalt.err (!%p3342_p2)
}
  0x65   : > { %s4399_s19 = smov 4   ;;  %s4400_s25 = smov 64  }
  0x66   : > { %3159 = dma.hbm_to_vmem [thread:$0]  (!%p3698_p7), %s3744_s26, 256, %s3748_s12, %s3706_s24, %s4400_s25, %s4400_s25, %s4399_s19  }
  0x67   : > { %p4401_p3 = scmp.eq.s32.totalorder %s3751_s14, 0  ;;  %p4402_p6 = scmp.ne.s32.totalorder %s4398_s13, 0 }
  0x68   : > { %s2820_s1 = sshll.u32 %s3520_s0, 4  ;;  %s4405_s27 = sld [smem:[#allocation26_spill]] }
  0x69   : > { %p4403_p8 = pneg %p4402_p6  ;;  %s3825_s29 = scalar_lea.hbm %s4333_s10, %s2820_s1 }
  0x6b   : > { %p3817_p1 = pnand %p4403_p8, %p4401_p3 }
  0x6d   : > { %p3348_p12 = pneg %p3817_p1 }
  0x6e   : > { %s4406_s17 = smov %s4405_s27  ;;  %s3346_s11 = scalar_lea.hbm %s4405_s27, 256 }
  0x6f   : > { %p3347_p4 = scmp.ne.s32.totalorder %s4406_s17, %s3346_s11  ;;  %p3353_p11 = scmp.lt.u32.totalorder %s3346_s11, %s4406_s17 }
  0x71   : > { %p3349_p13 = pnand %p3348_p12, %p3347_p4 }
  0x73   : > { %p3350_p10 = pneg %p3349_p13 }
  0x75   : > { %p3355_p5 = pnand %p3353_p11, %p3350_p10 }
  0x77   : > { %3358 = shalt.err (!%p3355_p5)
}
  0x78   : > { %s3359_s19 = scalar_lea.vmem %s3783_s22, 256  ;;  %p3367_p8 = scmp.lt.s32.totalorder %s3783_s22, %s3783_s22 }
  0x79   : > { %p3360_p0 = scmp.ne.s32.totalorder %s3783_s22, %s3359_s19  ;;  %p3368_p6 = scmp.lt.s32.totalorder %s3359_s19, %s3359_s19 }
  0x7b   : > { %p3362_p2 = pnand %p3360_p0, %p3348_p12  ;;  %p3369_p7 = por %p3368_p6, %p3367_p8 }
  0x7d   : > { %p3363_p3 = pneg %p3362_p2 }
  0x7f   : > { %p3370_p9 = pnand %p3369_p7, %p3363_p3 }
  0x81   : > { %3373 = shalt.err (!%p3370_p9)
}
  0x82   : > { %s3531_s8 = smov 128   ;;  %s3532_s9 = smov 8  }
  0x83   : > { %3152 = dma.hbm_to_vmem [thread:$0]  (!%p3817_p1), %s4406_s17, 256, %s3783_s22, [#allocation4], %s3531_s8, %s3531_s8, %s3532_s9  }
  0x84   : > { %s675_s20 = scalar_lea.vmem [#allocation9], %s3684_s2  ;;  %s673_s1 = scalar_lea.sflag [#allocation10], %s3684_s2 }
  0x85   : > { %s682_s25 = sshll.u32 %s675_s20, 4  ;;  %s3374_s16 = scalar_lea.hbm %s3825_s29, 16  ;;  %s683_s25 = int_to_ptr.vmem [resolvable:$true] %s682_s25 }
  0x86   : > { %p3375_p7 = scmp.ne.s32.totalorder %s3825_s29, %s3374_s16  ;;  %p4407_p9 = scmp.ne.s32.totalorder %s4388_s18, 0 }
  0x87   : > { %s3379_s24 = scalar_lea.hbm %s4333_s10, 32  ;;  %p3380_p12 = scmp.lt.u32.totalorder %s3825_s29, %s4333_s10 }
  0x88   : > { %p3377_p6 = pnand %p3375_p7, %p4407_p9  ;;  %p3381_p13 = scmp.lt.u32.totalorder %s3379_s24, %s3374_s16 }
  0x89   : > { %p3383_p1 = scmp.lt.u32.totalorder %s3374_s16, %s3825_s29 }
  0x8a   : > { %p3378_p4 = pneg %p3377_p6  ;;  %p3382_p10 = por %p3381_p13, %p3380_p12 }
  0x8c   : > { %p3384_p11 = por %p3383_p1, %p3382_p10 }
  0x8e   : > { %p3385_p5 = pnand %p3384_p11, %p3378_p4 }
  0x90   : > { %3388 = shalt.err (!%p3385_p5)
}
  0x91   : > { %s3389_s2 = scalar_lea.vmem %s683_s25, 16  ;;  %s3533_s22 = smov [#allocation9]  }
  0x92   : > { %p3390_p0 = scmp.ne.s32.totalorder %s683_s25, %s3389_s2  ;;  %s3394_s23 = sshll.u32 %s3533_s22, 4  ;;  %s3395_s23 = int_to_ptr.vmem [resolvable:$false] %s3394_s23 }
  0x93   : > { %s3396_s8 = scalar_lea.vmem %s3395_s23, 32  ;;  %p3397_p8 = scmp.lt.s32.totalorder %s683_s25, %s3395_s23 }
  0x94   : > { %p3392_p2 = pnand %p3390_p0, %p4407_p9  ;;  %p3398_p7 = scmp.lt.s32.totalorder %s3396_s8, %s3389_s2 }
  0x96   : > { %p3393_p3 = pneg %p3392_p2  ;;  %p3399_p6 = por %p3398_p7, %p3397_p8 }
  0x98   : > { %p3400_p12 = pnand %p3399_p6, %p3393_p3 }
  0x9a   : > { %3403 = shalt.err (!%p3400_p12)
}
  0x9b   : > { %p4408_p13 = scmp.ne.s32.totalorder %s4387_s21, 0  ;;  %p4409_p4 = scmp.ne.s32.totalorder %s4398_s13, 0 }
  0x9c   : > { %p4410_p10 = scmp.eq.s32.totalorder (!%p4409_p4), %s3751_s14, 0 }
  0x9d   : > { %3162 = dma.hbm_to_vmem [thread:$0]  (!%p4408_p13), %s3825_s29, 16, %s683_s25, %s673_s1  }
  0x9e   : > { %729 = sbr.rel (%p4409_p4) target bundleno = 4562 (0x11d2), region = 88 }
  0xa5   : > { %3483 = dma.done.wait (%p4410_p10), [#allocation4], 256   ;;  %p4411_p9 = pmov %p4410_p10 }
  0xa6   : > { %s735_s18 = sand.u32 1, %s3751_s14   ;;  %s3875_s9 = sand.u32 1, %s3508_s28  }
  0xa7   : > { %3485 = vsyncadd (%p4411_p9), [#allocation4], 4294967040  ;;  %s3878_s11 = sshll.u32 %s3875_s9, 4  ;;  %s736_s21 = scalar_lea.sflag [#allocation7], %s735_s18 }
  0xa8   : > { %s3881_s29 = scalar_lea.vmem [#allocation6], %s3878_s11  ;;  %p4412_p1 = scmp.ne.s32.totalorder %s4392_s7, 0 }
  0xaa   : > { %3487 = dma.done.wait (%p4412_p1), %s736_s21, 512  }
  0xab   : > { %3489 = vsyncadd (%p4412_p1), %s736_s21, 4294966784  ;;  %s748_s13 = scalar_lea.vmem [#allocation8], %s3878_s11  ;;  %s754_s27 = scalar_lea.sflag [#allocation10], %s3875_s9 }
  0xac   : > { %s756_s20 = scalar_lea.vmem [#allocation9], %s3875_s9 }
  0xad   : > { %3491 = dma.done.wait (%p4412_p1), %s754_s27, 16  }
  0xae   : > { %3493 = vsyncadd (%p4412_p1), %s754_s27, 4294967280  ;;  %p866_p11 = scmp.lt.s32.totalorder %s3516_s30, 1  ;;  %p916_p5 = scmp.eq.s32.totalorder %s3516_s30, 0  ;;  %v3534_v0 = vmov 0.0   ;;  %vm3535_vm0 = vmmov 0   ;;  %v917_v4 = vld [vmem:[#allocation3] sm:$0xff] }
  0xaf   : > { %2969 = vmatprep.subr.bf16.mxu1 %v3534_v0  ;;  %2973 = vmatprep.mubr.msk.bf16.mxu1 %vm3535_vm0, %v3534_v0  ;;  %s4413_s12 = sld [smem:[#allocation27_spill]]  ;;  %s4414_s2 = sld [smem:[#allocation28_spill]]  ;;  %v918_v5 = vld [vmem:[#allocation3 + $0x8] sm:$0xff]  ;;  %v919_v6 = vld [vmem:[#allocation2] sm:$0xff]  ;;  %v920_v7 = vld [vmem:[#allocation2 + $0x8] sm:$0xff]  ;;  %vm950_vm2 = vcmask 261120  }
  0xb0   : > { %s3900_s25 = scalar_select %p866_p11, %s3516_s30, 1  ;;  %2985 = vmatprep.subr.bf16.mxu0 %v3534_v0  ;;  %2989 = vmatprep.mubr.msk.bf16.mxu0 %vm3535_vm0, %v3534_v0  ;;  %vm1141_vm3 = vcmask 64512   ;;  %vm1263_vm4 = vcmask 1043456   ;;  %vm2392_vm5 = vcmask 523264  }
  0xb1   : > { %s921_s7 = scalar_select %p916_p5, 1, 0 }
  0xb2   : > { %s3906_s1 = sshll.u32 %s3900_s25, 4  ;;  %s883_s15 = scalar_lea.vmem %s4327_s4, %s3900_s25 }
  0xb3   : > { %v922_v1 = vstv %s921_s7  ;;  %s880_s18 = scalar_lea.vmem %s4326_s3, %s3906_s1  ;;  %s886_s7 = scalar_lea.vmem %s4328_s5, %s3900_s25  ;;  %v2834_v27 = vld [vmem:[%s883_s15] ss:$0 sm:$0xff] }
  0xb4   : > { %vm923_vm1 = vcmp.eq.s32.totalorder %v922_v1, 1  ;;  %v3238_v13 = vld [vmem:[%s880_s18] sm:$0xff]   ;;  %v3239_v14 = vld [vmem:[%s880_s18 + $0x8] sm:$0xff]   ;;  %s889_s19 = scalar_lea.vmem %s4329_s6, %s3900_s25  ;;  %s4150_s23 = scalar_lea.vmem [#allocation12], %s3878_s11 }
  0xb5   : > { %s870_s24 = scalar_lea.vmem %s4413_s12, %s3906_s1  ;;  %s875_s22 = scalar_lea.vmem %s4414_s2, %s3906_s1  ;;  %v3917_v8 = vsel %vm923_vm1, %v917_v4, %v919_v6  ;;  %v3919_v9 = vsel %vm923_vm1, %v918_v5, %v920_v7  ;;  %2986 = vmatpush3.bf16.msra.mxu0 %v3238_v13  ;;  %v2840_v19 = vld [vmem:[%s886_s7] ss:$0 sm:$0xff] }
  0xb6   : > { %v3234_v2 = vld [vmem:[%s870_s24] sm:$0xff]   ;;  %v3235_v3 = vld [vmem:[%s870_s24 + $0x8] sm:$0xff]   ;;  %v926_v10 = vpack.c.bf16 %v3919_v9, %v3917_v8  ;;  %2987 = vmatprep.subr.bf16.mxu0 %v3534_v0  ;;  %s3536_s12 = smov 120   ;;  %s3537_s2 = smov 112  }
  0xb7   : > { %2970 = vmatpush3.bf16.msra.mxu1 %v3234_v2  ;;  %v3236_v11 = vld [vmem:[%s875_s22] sm:$0xff]   ;;  %v3237_v12 = vld [vmem:[%s875_s22 + $0x8] sm:$0xff]   ;;  %s3538_s22 = smov 104   ;;  %s4415_s18 = sld [smem:[#allocation30_spill]] }
  0xb8   : > { %2971 = vmatprep.subr.bf16.mxu1 %v3534_v0  ;;  %v2846_v36 = vld [vmem:[%s889_s19] ss:$0 sm:$0xff]  ;;  %s2904_s27 = sshll.u32 %s3900_s25, 5  ;;  %s4416_s16 = sld [smem:[#allocation32_spill]] }
  0xb9   : > { %2988 = vmatpush3.bf16.msra.mxu0 %v3239_v14  ;;  %s4420_s7 = sld [smem:[#allocation36_spill]]  ;;  %s4421_s11 = sld [smem:[#allocation37_spill]] }
  0xba   : > { %2999 = vmatprep.subr.bf16.mxu0 %v3534_v0  ;;  %p2890_p0 = scmp.ge.s32.totalorder %s3516_s30, 1 }
  0xbb   : > { %2972 = vmatpush3.bf16.msra.mxu1 %v3235_v3 }
  0xbc   : > { %2977 = vmatprep.subr.bf16.mxu1 %v3534_v0  ;;  %2990 = vmatmul.mubr.msk.bf16.vlgmr.msra.gmra.mrb[0].mxu0 %vm950_vm2, %v926_v10 }
  0xbd   : > { %3001 = vmatprep.mubr.msk.bf16.mxu0 %vm3535_vm0, %v3534_v0  ;;  %s892_s21 = scalar_lea.vmem %s4415_s18, %s3900_s25  ;;  %s4419_s18 = sld [smem:[#allocation33_spill]] }
  0xbe   : > { %2974 = vmatmul.mubr.msk.bf16.vlgmr.msra.gmra.mrb[0].mxu1 %vm950_vm2, %v926_v10  ;;  %s4197_s15 = scalar_lea.vmem %s4416_s16, %s2904_s27 }
  0xbf   : > { %2978 = vmatpush3.bf16.msra.mxu1 %v3236_v11  ;;  %2981 = vmatprep.mubr.msk.bf16.mxu1 %vm3535_vm0, %v3534_v0  ;;  %s909_s1 = scalar_lea.vmem %s4420_s7, %s3900_s25 }
  0xc0   : > { %2979 = vmatprep.subr.bf16.mxu1 %v3534_v0 }
  0xc3   : > { %2980 = vmatpush3.bf16.msra.mxu1 %v3237_v12 }
  0xc4   : > { %2993 = vmatprep.subr.bf16.mxu1 %v3534_v0 }
  0xc6   : > { %2982 = vmatmul.mubr.msk.bf16.vlgmr.msra.gmra.mrb[4].mxu1 %vm950_vm2, %v926_v10 }
  0xc7   : > { %2995 = vmatprep.mubr.msk.bf16.mxu1 %vm3535_vm0, %v3534_v0 }
 0x18f   : > { %v1128_v35 = vpop.f32.mrb[0].mxu0 }
 0x190   : > { %v2991_v37 = vpop.f32.mrb[1].mxu0  ;;  %v1129_v40 = vadd.f32 %v2846_v36, %v1128_v35 }
 0x191   : > { %v988_v15 = vpop.f32.mrb[0].mxu1  ;;  %v1131_v38 = vpop.f32.mrb[2].mxu0 }
 0x192   : > { %v2975_v16 = vpop.f32.mrb[1].mxu1  ;;  %v989_v30 = vadd.f32 %v2834_v27, %v988_v15  ;;  %v2992_v39 = vpop.f32.mrb[3].mxu0  ;;  %v1132_v41 = vadd.f32 %v2846_v36, %v1131_v38  ;;  %v3977_v42 = vpack.c.bf16 %v1129_v40, %v1129_v40 }
 0x193   : > { %v991_v17 = vpop.f32.mrb[2].mxu1 }
 0x194   : > { %v2976_v18 = vpop.f32.mrb[3].mxu1  ;;  %v992_v32 = vadd.f32 %v2834_v27, %v991_v17  ;;  %v3961_v33 = vpack.c.bf16 %v989_v30, %v989_v30  ;;  %v3979_v43 = vpack.c.bf16 %v1132_v41, %v1132_v41  ;;  %v1265_v44 = vsel %vm1263_vm4, %v3977_v42, 0 }
 0x196   : > { %v3963_v34 = vpack.c.bf16 %v992_v32, %v992_v32  ;;  %v1311_v45 = vsel %vm1263_vm4, %v3979_v43, 0 }
 0x199   : > { %v1058_v20 = vpop.f32.mrb[4].mxu1 }
 0x19a   : > { %v1059_v21 = vadd.f32 %v2840_v19, %v1058_v20  ;;  %v2983_v22 = vpop.f32.mrb[5].mxu1 }
 0x19b   : > { %v1061_v23 = vpop.f32.mrb[6].mxu1 }
 0x19c   : > { %v3949_v24 = vpack.c.bf16 %v1059_v21, %v1059_v21  ;;  %v1062_v25 = vadd.f32 %v2840_v19, %v1061_v23  ;;  %v2984_v26 = vpop.f32.mrb[7].mxu1 }
 0x19e   : > { %v3951_v28 = vpack.c.bf16 %v1062_v25, %v1062_v25  ;;  %v1146_v29 = vsel %vm1141_vm3, %v3949_v24, 0 }
 0x19f   : > { %2994 = vmatpush3.bf16.xpose.msra.mxu1 %v1146_v29 }
 0x1a0   : > { %1407 = vrot.lane.b32.xlu1 %v3951_v28, %s3536_s12  ;;  %v1192_v31 = vsel %vm1141_vm3, %v3951_v28, 0  ;;  %3005 = vmatprep.subr.bf16.mxu1 %v3534_v0 }
 0x1a1   : > { %3000 = vmatpush3.bf16.xpose.msra.mxu0 %v1192_v31 }
 0x1a2   : > { %3011 = vmatprep.subr.bf16.mxu0 %v3534_v0 }
 0x1a6   : > { %2996 = vmatmul.mubr.msk.bf16.vlgmr.msra.gmra.mrb[8].mxu1 %vm1141_vm3, %v3961_v33 }
 0x1a7   : > { %3007 = vmatprep.mubr.msk.bf16.mxu1 %vm3535_vm0, %v3534_v0  ;;  %3006 = vmatpush3.bf16.msra.mxu1 %v1265_v44 }
 0x1a8   : > { %3002 = vmatmul.mubr.msk.bf16.vlgmr.msra.gmra.mrb[4].mxu0 %vm1141_vm3, %v3963_v34  ;;  %3017 = vmatprep.subr.bf16.mxu1 %v3534_v0 }
 0x1a9   : > { %3013 = vmatprep.mubr.msk.bf16.mxu0 %vm3535_vm0, %v3534_v0  ;;  %3012 = vmatpush3.bf16.msra.mxu0 %v1311_v45 }
 0x1aa   : > { %3023 = vmatprep.subr.bf16.mxu0 %v3534_v0 }
 0x212   : > { %v1408_v3 = vpop.permute.xlu1 %1407 }
 0x213   : > { %v1413_v16 = vsel %vm1141_vm3, %v1408_v3, 0  ;;  %v1354_v3 = vld [vmem:[%s3881_s29] sm:$0xf] }
 0x279   : > { %v1182_v46 = vpop.f32.mrb[8].mxu1 }
 0x27a   : > { %v2997_v47 = vpop.f32.mrb[9].mxu1  ;;  %v1234_v48 = vsel %vm1141_vm3, %v1182_v46, -inf }
 0x27b   : > { %v1228_v49 = vpop.f32.mrb[4].mxu0  ;;  %1235 = vmax.xlane.f32.xlu0 %v1234_v48  ;;  %v1185_v50 = vpop.f32.mrb[10].mxu1 }
 0x27c   : > { %v2998_v51 = vpop.f32.mrb[11].mxu1  ;;  %v3003_v52 = vpop.f32.mrb[5].mxu0  ;;  %v1237_v55 = vsel %vm1141_vm3, %v1228_v49, -inf }
 0x27d   : > { %v1231_v53 = vpop.f32.mrb[6].mxu0 }
 0x27e   : > { %v3004_v54 = vpop.f32.mrb[7].mxu0 }
 0x27f   : > { %1238 = vmax.xlane.f32.xlu0 %v1237_v55 }
 0x295   : > { %1357 = vrot.lane.b32.xlu0 %v3949_v24, %s3536_s12 }
 0x308   : > { %v1236_v56 = vpop.xlane.xlu0 %1235 }
 0x309   : > { %v1240_v57 = vsub.f32 %v1182_v46, %v1236_v56 }
 0x30b   : > { %v1242_v58 = vmul.f32 1.442695, %v1240_v57 }
 0x30c   : > { %v1239_v59 = vpop.xlane.xlu0 %1238 }
 0x30d   : > { %3246 = vpow2.f32 %v1242_v58  ;;  %v1241_v60 = vsub.f32 %v1228_v49, %v1239_v59 }
 0x30f   : > { %v1244_v61 = vmul.f32 1.442695, %v1241_v60 }
 0x310   : > { %v1358_v10 = vpop.permute.xlu0 %1357 }
 0x311   : > { %3248 = vpow2.f32 %v1244_v61  ;;  %v1363_v13 = vsel %vm1141_vm3, %v1358_v10, 0  ;;  %v2860_v61 = vld [vmem:[%s3881_s29 + $0x4] sm:$0xf] }
 0x317   : > { %v3247_v62 = vpop.eup %3246 }
 0x318   : > { %v1246_v63 = vsel %vm1141_vm3, %v3247_v62, 0.0 }
 0x319   : > { %1247 = vadd.xlane.f32.xlu1 %v1246_v63 }
 0x31b   : > { %v3249_v1 = vpop.eup %3248 }
 0x31c   : > { %v1249_v2 = vsel %vm1141_vm3, %v3249_v1, 0.0 }
 0x31d   : > { %1250 = vadd.xlane.f32.xlu1 %v1249_v2 }
 0x32e   : > { %1355 = vrot.lane.b32.xlu1 %v3961_v33, %s3536_s12 }
 0x332   : > { %1405 = vrot.lane.b32.xlu1 %v3963_v34, %s3536_s12 }
 0x3a6   : > { %v1248_v4 = vpop.xlane.xlu1 %1247 }
 0x3a7   : > { %3250 = vrcp.f32 %v1248_v4 }
 0x3aa   : > { %v1251_v5 = vpop.xlane.xlu1 %1250 }
 0x3ab   : > { %3252 = vrcp.f32 %v1251_v5 }
 0x3ae   : > { %v1356_v17 = vpop.permute.xlu1 %1355 }
 0x3b1   : > { %v3251_v6 = vpop.eup %3250 }
 0x3b2   : > { %v3997_v7 = vmul.f32 %v3251_v6, %v3247_v62  ;;  %v1406_v18 = vpop.permute.xlu1 %1405  ;;  %v1631_v6 = vsel %vm1263_vm4, %v1354_v3, 0 }
 0x3b4   : > { %v1258_v11 = vpack.c.bf16 %v3997_v7, %v3997_v7 }
 0x3b5   : > { %v3253_v12 = vpop.eup %3252 }
 0x3b6   : > { %v4002_v14 = vmul.f32 %v3253_v12, %v3249_v1  ;;  %3008 = vmatmul.mubr.msk.bf16.vlgmr.msra.gmra.mrb[12].mxu1 %vm1141_vm3, %v1258_v11  ;;  %v1584_v1 = vsel %vm1263_vm4, %v2860_v61, 0 }
 0x3b7   : > { %3018 = vmatpush3.bf16.xpose.msra.mxu1 %v1363_v13  ;;  %3019 = vmatprep.mubr.msk.bf16.mxu1 %vm3535_vm0, %v3534_v0 }
 0x3b8   : > { %v1259_v15 = vpack.c.bf16 %v4002_v14, %v4002_v14  ;;  %3029 = vmatprep.subr.bf16.mxu1 %v3534_v0 }
 0x3ba   : > { %3014 = vmatmul.mubr.msk.bf16.vlgmr.msra.gmra.mrb[8].mxu0 %vm1141_vm3, %v1259_v15 }
 0x3bb   : > { %3024 = vmatpush3.bf16.xpose.msra.mxu0 %v1413_v16  ;;  %3025 = vmatprep.mubr.msk.bf16.mxu0 %vm3535_vm0, %v3534_v0 }
 0x3bc   : > { %3035 = vmatprep.subr.bf16.mxu0 %v3534_v0 }
 0x3be   : > { %3020 = vmatmul.mubr.msk.bf16.vlgmr.msra.gmra.mrb[16].mxu1 %vm1141_vm3, %v1356_v17 }
 0x3bf   : > { %3031 = vmatprep.mubr.msk.bf16.mxu1 %vm3535_vm0, %v3534_v0 }
 0x3c2   : > { %3026 = vmatmul.mubr.msk.bf16.vlgmr.msra.gmra.mrb[12].mxu0 %vm1141_vm3, %v1406_v18 }
 0x3c3   : > { %3037 = vmatprep.mubr.msk.bf16.mxu0 %vm3535_vm0, %v3534_v0 }
 0x489   : > { %v4021_v19 = vpop.f32.mrb[12].mxu1 }
 0x48a   : > { %v3009_v20 = vpop.f32.mrb[13].mxu1 }
 0x48b   : > { %v1304_v21 = vpop.f32.mrb[14].mxu1 }
 0x48c   : > { %v3010_v22 = vpop.f32.mrb[15].mxu1 }
 0x48d   : > { %v4023_v23 = vpop.f32.mrb[8].mxu0 }
 0x48e   : > { %v1353_v25 = vpack.c.bf16 %v4023_v23, %v4021_v19  ;;  %v3015_v26 = vpop.f32.mrb[9].mxu0 }
 0x48f   : > { %v1350_v27 = vpop.f32.mrb[10].mxu0 }
 0x490   : > { %v3016_v29 = vpop.f32.mrb[11].mxu0 }
 0x491   : > { %v1399_v30 = vpop.f32.mrb[16].mxu1 }
 0x492   : > { %v3021_v31 = vpop.f32.mrb[17].mxu1  ;;  %v1455_v32 = vsel %vm1141_vm3, %v1399_v30, -inf }
 0x493   : > { %1456 = vmax.xlane.f32.xlu0 %v1455_v32  ;;  %v1402_v35 = vpop.f32.mrb[18].mxu1 }
 0x494   : > { %v3022_v36 = vpop.f32.mrb[19].mxu1 }
 0x495   : > { %v1449_v37 = vpop.f32.mrb[12].mxu0 }
 0x496   : > { %v3027_v38 = vpop.f32.mrb[13].mxu0  ;;  %v1458_v39 = vsel %vm1141_vm3, %v1449_v37, -inf }
 0x497   : > { %1459 = vmax.xlane.f32.xlu1 %v1458_v39  ;;  %v1452_v40 = vpop.f32.mrb[14].mxu0 }
 0x498   : > { %v3028_v41 = vpop.f32.mrb[15].mxu0 }
 0x4a8   : > { %1529 = vrot.lane.b32.xlu1 %v3979_v43, %s3536_s12 }
 0x4ac   : > { %1676 = vrot.lane.b32.xlu1 %v3949_v24, %s3537_s2 }
 0x4b0   : > { %1726 = vrot.lane.b32.xlu1 %v3951_v28, %s3537_s2 }
 0x4b4   : > { %1724 = vrot.lane.b32.xlu1 %v3963_v34, %s3537_s2 }
 0x520   : > { %v1457_v44 = vpop.xlane.xlu0 %1456 }
 0x521   : > { %v1461_v45 = vsub.f32 %v1399_v30, %v1457_v44 }
 0x523   : > { %v1463_v46 = vmul.f32 1.442695, %v1461_v45 }
 0x524   : > { %v1460_v47 = vpop.xlane.xlu1 %1459 }
 0x525   : > { %3254 = vpow2.f32 %v1463_v46  ;;  %v1462_v48 = vsub.f32 %v1449_v37, %v1460_v47 }
 0x527   : > { %v1465_v49 = vmul.f32 1.442695, %v1462_v48 }
 0x528   : > { %v1530_v50 = vpop.permute.xlu1 %1529 }
 0x529   : > { %3256 = vpow2.f32 %v1465_v49  ;;  %v1535_v51 = vsel %vm1263_vm4, %v1530_v50, 0 }
 0x52a   : > { %3036 = vmatpush3.bf16.msra.mxu0 %v1535_v51 }
 0x52b   : > { %3047 = vmatprep.subr.bf16.mxu0 %v3534_v0 }
 0x52c   : > { %v1677_v10 = vpop.permute.xlu1 %1676 }
 0x52d   : > { %v1682_v23 = vsel %vm1141_vm3, %v1677_v10, 0 }
 0x52f   : > { %v3255_v52 = vpop.eup %3254 }
 0x530   : > { %v1467_v53 = vsel %vm1141_vm3, %v3255_v52, 0.0  ;;  %v1727_v11 = vpop.permute.xlu1 %1726 }
 0x531   : > { %1468 = vadd.xlane.f32.xlu0 %v1467_v53  ;;  %v1732_v12 = vsel %vm1141_vm3, %v1727_v11, 0 }
 0x533   : > { %v3257_v54 = vpop.eup %3256 }
 0x534   : > { %v1470_v55 = vsel %vm1141_vm3, %v3257_v54, 0.0  ;;  %v1725_v13 = vpop.permute.xlu1 %1724 }
 0x535   : > { %1471 = vadd.xlane.f32.xlu0 %v1470_v55 }
 0x54b   : > { %1481 = vrot.lane.b32.xlu0 %v3977_v42, %s3536_s12  ;;  %s4417_s12 = sld [smem:[#allocation34_spill]] }
 0x54f   : > { %1674 = vrot.lane.b32.xlu0 %v3961_v33, %s3537_s2 }
 0x551   : > { %s903_s24 = scalar_lea.vmem %s4417_s12, %s3900_s25 }
 0x5be   : > { %v1469_v56 = vpop.xlane.xlu0 %1468 }
 0x5bf   : > { %3258 = vrcp.f32 %v1469_v56 }
 0x5c2   : > { %v1472_v57 = vpop.xlane.xlu0 %1471 }
 0x5c3   : > { %3260 = vrcp.f32 %v1472_v57 }
 0x5c6   : > { %v1482_v58 = vpop.permute.xlu0 %1481 }
 0x5c7   : > { %v1487_v59 = vsel %vm1263_vm4, %v1482_v58, 0 }
 0x5c8   : > { %3030 = vmatpush3.bf16.msra.mxu1 %v1487_v59 }
 0x5c9   : > { %v3259_v60 = vpop.eup %3258  ;;  %3041 = vmatprep.subr.bf16.mxu1 %v3534_v0 }
 0x5ca   : > { %v4048_v62 = vmul.f32 %v3259_v60, %v3255_v52  ;;  %v1675_v29 = vpop.permute.xlu0 %1674 }
 0x5cc   : > { %v1479_v63 = vpack.c.bf16 %v4048_v62, %v4048_v62 }
 0x5cd   : > { %v3261_v2 = vpop.eup %3260 }
 0x5ce   : > { %v4054_v4 = vmul.f32 %v3261_v2, %v3257_v54  ;;  %3032 = vmatmul.mubr.msk.bf16.vlgmr.msra.gmra.mrb[20].mxu1 %vm1141_vm3, %v1479_v63 }
 0x5cf   : > { %3042 = vmatpush3.bf16.msra.mxu1 %v1584_v1  ;;  %3043 = vmatprep.mubr.msk.bf16.mxu1 %vm3535_vm0, %v3534_v0 }
 0x5d0   : > { %v1480_v5 = vpack.c.bf16 %v4054_v4, %v4054_v4  ;;  %3053 = vmatprep.subr.bf16.mxu1 %v3534_v0  ;;  %v1478_v1 = vadd.f32 %v4054_v4, %v4002_v14 }
 0x5d2   : > { %3038 = vmatmul.mubr.msk.bf16.vlgmr.msra.gmra.mrb[16].mxu0 %vm1141_vm3, %v1480_v5 }
 0x5d3   : > { %3048 = vmatpush3.bf16.msra.mxu0 %v1631_v6  ;;  %3049 = vmatprep.mubr.msk.bf16.mxu0 %vm3535_vm0, %v3534_v0 }
 0x5d4   : > { %3059 = vmatprep.subr.bf16.mxu0 %v3534_v0 }
 0x5da   : > { %3050 = vmatmul.mubr.msk.bf16.vlgmr.msra.gmra.mrb[20].mxu0 %vm1141_vm3, %v1353_v25 }
 0x5db   : > { %3061 = vmatprep.mubr.msk.bf16.mxu0 %vm3535_vm0, %v3534_v0 }
 0x5dc   : > { %3060 = vmatpush3.bf16.xpose.msra.mxu0 %v1732_v12 }
 0x5dd   : > { %3071 = vmatprep.subr.bf16.mxu0 %v3534_v0 }
 0x5e3   : > { %3062 = vmatmul.mubr.msk.bf16.vlgmr.msra.gmra.mrb[24].mxu0 %vm1141_vm3, %v1725_v13 }
 0x5e4   : > { %3073 = vmatprep.mubr.msk.bf16.mxu0 %vm3535_vm0, %v3534_v0 }
 0x6a1   : > { %v1523_v15 = vpop.f32.mrb[20].mxu1 }
 0x6a2   : > { %v3033_v16 = vpop.f32.mrb[21].mxu1 }
 0x6a3   : > { %v1526_v17 = vpop.f32.mrb[22].mxu1 }
 0x6a4   : > { %v3034_v18 = vpop.f32.mrb[23].mxu1 }
 0x6a5   : > { %v1571_v19 = vpop.f32.mrb[16].mxu0 }
 0x6a6   : > { %v1577_v20 = vpack.c.bf16 %v1571_v19, %v1523_v15  ;;  %v3039_v21 = vpop.f32.mrb[17].mxu0  ;;  %v1477_v15 = vadd.f32 %v4048_v62, %v3997_v7 }
 0x6a7   : > { %v1574_v22 = vpop.f32.mrb[18].mxu0 }
 0x6a8   : > { %v3040_v25 = vpop.f32.mrb[19].mxu0  ;;  %3044 = vmatmul.mubr.msk.bf16.vlgmr.msra.gmra.mrb[24].mxu1 %vm1141_vm3, %v1577_v20  ;;  %v2867_v22 = vld [vmem:[%s3881_s29 + $0x8] sm:$0xf] }
 0x6a9   : > { %3054 = vmatpush3.bf16.xpose.msra.mxu1 %v1682_v23  ;;  %3055 = vmatprep.mubr.msk.bf16.mxu1 %vm3535_vm0, %v3534_v0  ;;  %v1903_v23 = vsel %vm1263_vm4, %v2867_v22, 0 }
 0x6aa   : > { %3065 = vmatprep.subr.bf16.mxu1 %v3534_v0 }
 0x6ad   : > { %v1667_v26 = vpop.f32.mrb[20].mxu0 }
 0x6ae   : > { %v3051_v27 = vpop.f32.mrb[21].mxu0 }
 0x6af   : > { %v1670_v30 = vpop.f32.mrb[22].mxu0 }
 0x6b0   : > { %v3052_v31 = vpop.f32.mrb[23].mxu0  ;;  %3056 = vmatmul.mubr.msk.bf16.vlgmr.msra.gmra.mrb[28].mxu1 %vm1141_vm3, %v1675_v29 }
 0x6b1   : > { %3067 = vmatprep.mubr.msk.bf16.mxu1 %vm3535_vm0, %v3534_v0 }
 0x6b6   : > { %v1768_v32 = vpop.f32.mrb[24].mxu0 }
 0x6b7   : > { %v3063_v35 = vpop.f32.mrb[25].mxu0  ;;  %v1777_v36 = vsel %vm1141_vm3, %v1768_v32, -inf }
 0x6b8   : > { %1778 = vmax.xlane.f32.xlu1 %v1777_v36  ;;  %v1771_v37 = vpop.f32.mrb[26].mxu0 }
 0x6b9   : > { %v3064_v38 = vpop.f32.mrb[27].mxu0 }
 0x6c9   : > { %1848 = vrot.lane.b32.xlu1 %v3979_v43, %s3537_s2 }
 0x6cd   : > { %1950 = vrot.lane.b32.xlu1 %v3949_v24, %s3538_s22 }
 0x6d1   : > { %2000 = vrot.lane.b32.xlu1 %v3951_v28, %s3538_s22 }
 0x6d5   : > { %1998 = vrot.lane.b32.xlu1 %v3963_v34, %s3538_s22 }
 0x745   : > { %v1779_v39 = vpop.xlane.xlu1 %1778 }
 0x746   : > { %v1781_v44 = vsub.f32 %v1768_v32, %v1779_v39 }
 0x748   : > { %v1784_v45 = vmul.f32 1.442695, %v1781_v44 }
 0x749   : > { %v1849_v40 = vpop.permute.xlu1 %1848 }
 0x74a   : > { %v1854_v41 = vsel %vm1263_vm4, %v1849_v40, 0  ;;  %3262 = vpow2.f32 %v1784_v45 }
 0x74b   : > { %3072 = vmatpush3.bf16.msra.mxu0 %v1854_v41 }
 0x74c   : > { %3083 = vmatprep.subr.bf16.mxu0 %v3534_v0 }
 0x74d   : > { %v1951_v3 = vpop.permute.xlu1 %1950 }
 0x74e   : > { %v1956_v10 = vsel %vm1141_vm3, %v1951_v3, 0 }
 0x751   : > { %v2001_v29 = vpop.permute.xlu1 %2000 }
 0x752   : > { %v2006_v36 = vsel %vm1141_vm3, %v2001_v29, 0 }
 0x754   : > { %v3263_v52 = vpop.eup %3262 }
 0x755   : > { %v1789_v55 = vsel %vm1141_vm3, %v3263_v52, 0.0  ;;  %v1999_v38 = vpop.permute.xlu1 %1998 }
 0x77b   : > { %v1620_v46 = vpop.f32.mrb[24].mxu1 }
 0x77c   : > { %v4097_v47 = vadd.f32 %v1667_v26, %v1620_v46  ;;  %v3045_v24 = vpop.f32.mrb[25].mxu1 }
 0x77d   : > { %v1623_v48 = vpop.f32.mrb[26].mxu1 }
 0x77e   : > { %v4099_v49 = vadd.f32 %v1670_v30, %v1623_v48  ;;  %v3046_v28 = vpop.f32.mrb[27].mxu1 }
 0x783   : > { %v1718_v50 = vpop.f32.mrb[28].mxu1 }
 0x784   : > { %v3057_v34 = vpop.f32.mrb[29].mxu1  ;;  %v1774_v51 = vsel %vm1141_vm3, %v1718_v50, -inf }
 0x785   : > { %1775 = vmax.xlane.f32.xlu0 %v1774_v51  ;;  %v1721_v53 = vpop.f32.mrb[30].mxu1 }
 0x786   : > { %v3058_v54 = vpop.f32.mrb[31].mxu1 }
 0x789   : > { %1790 = vadd.xlane.f32.xlu0 %v1789_v55 }
 0x812   : > { %v1776_v56 = vpop.xlane.xlu0 %1775 }
 0x813   : > { %v1780_v57 = vsub.f32 %v1718_v50, %v1776_v56 }
 0x815   : > { %v1782_v58 = vmul.f32 1.442695, %v1780_v57 }
 0x816   : > { %v1791_v59 = vpop.xlane.xlu0 %1790 }
 0x817   : > { %3264 = vpow2.f32 %v1782_v58 }
 0x818   : > { %3266 = vrcp.f32 %v1791_v59 }
 0x821   : > { %v3265_v60 = vpop.eup %3264 }
 0x822   : > { %v3267_v61 = vpop.eup %3266  ;;  %v1786_v63 = vsel %vm1141_vm3, %v3265_v60, 0.0 }
 0x823   : > { %v1795_v2 = vmul.f32 %v3267_v61, %v3263_v52  ;;  %1787 = vadd.xlane.f32.xlu0 %v1786_v63 }
 0x825   : > { %v4106_v5 = vadd.f32 %v1795_v2, %v1478_v1  ;;  %v1799_v6 = vpack.c.bf16 %v1795_v2, %v1795_v2 }
 0x827   : > { %3074 = vmatmul.mubr.msk.bf16.vlgmr.msra.gmra.mrb[28].mxu0 %vm1141_vm3, %v1799_v6 }
 0x828   : > { %3084 = vmatpush3.bf16.xpose.msra.mxu0 %v1956_v10  ;;  %3085 = vmatprep.mubr.msk.bf16.mxu0 %vm3535_vm0, %v3534_v0 }
 0x829   : > { %3095 = vmatprep.subr.bf16.mxu0 %v3534_v0 }
 0x839   : > { %1800 = vrot.lane.b32.xlu0 %v3977_v42, %s3537_s2  ;;  %s4418_s2 = sld [smem:[#allocation35_spill]] }
 0x83d   : > { %1948 = vrot.lane.b32.xlu0 %v3961_v33, %s3538_s22 }
 0x8b0   : > { %v1788_v14 = vpop.xlane.xlu0 %1787 }
 0x8b1   : > { %3268 = vrcp.f32 %v1788_v14 }
 0x8b4   : > { %v1801_v4 = vpop.permute.xlu0 %1800 }
 0x8b5   : > { %v1806_v11 = vsel %vm1263_vm4, %v1801_v4, 0 }
 0x8b6   : > { %3066 = vmatpush3.bf16.msra.mxu1 %v1806_v11 }
 0x8b7   : > { %3077 = vmatprep.subr.bf16.mxu1 %v3534_v0 }
 0x8b8   : > { %v1949_v12 = vpop.permute.xlu0 %1948 }
 0x8b9   : > { %3086 = vmatmul.mubr.msk.bf16.vlgmr.msra.gmra.mrb[32].mxu0 %vm1141_vm3, %v1949_v12 }
 0x8ba   : > { %3097 = vmatprep.mubr.msk.bf16.mxu0 %vm3535_vm0, %v3534_v0 }
 0x8bb   : > { %v3269_v13 = vpop.eup %3268 }
 0x8bc   : > { %v1794_v33 = vmul.f32 %v3269_v13, %v3265_v60 }
 0x8be   : > { %v1796_v16 = vadd.f32 %v1794_v33, %v1477_v15  ;;  %v1798_v17 = vpack.c.bf16 %v1794_v33, %v1794_v33  ;;  %v2873_v15 = vld [vmem:[%s3881_s29 + $0xc] sm:$0xf] }
 0x8bf   : > { %v2177_v33 = vsel %vm1263_vm4, %v2873_v15, 0 }
 0x8c0   : > { %3068 = vmatmul.mubr.msk.bf16.vlgmr.msra.gmra.mrb[32].mxu1 %vm1141_vm3, %v1798_v17 }
 0x8c1   : > { %3079 = vmatprep.mubr.msk.bf16.mxu1 %vm3535_vm0, %v3534_v0  ;;  %3078 = vmatpush3.bf16.msra.mxu1 %v1903_v23 }
 0x8c2   : > { %3089 = vmatprep.subr.bf16.mxu1 %v3534_v0 }
 0x8fa   : > { %v1890_v18 = vpop.f32.mrb[28].mxu0 }
 0x8fb   : > { %v3075_v19 = vpop.f32.mrb[29].mxu0 }
 0x8fc   : > { %v1893_v20 = vpop.f32.mrb[30].mxu0 }
 0x8fd   : > { %v3076_v21 = vpop.f32.mrb[31].mxu0 }
 0x98c   : > { %v1992_v25 = vpop.f32.mrb[32].mxu0 }
 0x98d   : > { %v3087_v7 = vpop.f32.mrb[33].mxu0  ;;  %v2048_v62 = vsel %vm1141_vm3, %v1992_v25, -inf }
 0x98e   : > { %2049 = vmax.xlane.f32.xlu0 %v2048_v62  ;;  %v1995_v26 = vpop.f32.mrb[34].mxu0  ;;  %v2875_v7 = vld [vmem:[%s892_s21] ss:$0 sm:$0xff]  ;;  %s900_s21 = scalar_lea.vmem %s4419_s18, %s3900_s25 }
 0x98f   : > { %v3088_v27 = vpop.f32.mrb[35].mxu0 }
 0x993   : > { %v1842_v30 = vpop.f32.mrb[32].mxu1 }
 0x994   : > { %v1896_v31 = vpack.c.bf16 %v1890_v18, %v1842_v30  ;;  %v3069_v32 = vpop.f32.mrb[33].mxu1 }
 0x995   : > { %v1845_v35 = vpop.f32.mrb[34].mxu1 }
 0x996   : > { %v3070_v37 = vpop.f32.mrb[35].mxu1  ;;  %3080 = vmatmul.mubr.msk.bf16.vlgmr.msra.gmra.mrb[36].mxu1 %vm1141_vm3, %v1896_v31 }
 0x997   : > { %3090 = vmatpush3.bf16.xpose.msra.mxu1 %v2006_v36  ;;  %3091 = vmatprep.mubr.msk.bf16.mxu1 %vm3535_vm0, %v3534_v0 }
 0x998   : > { %3101 = vmatprep.subr.bf16.mxu1 %v3534_v0 }
 0x99e   : > { %3092 = vmatmul.mubr.msk.bf16.vlgmr.msra.gmra.mrb[40].mxu1 %vm1141_vm3, %v1999_v38 }
 0x99f   : > { %3103 = vmatprep.mubr.msk.bf16.mxu1 %vm3535_vm0, %v3534_v0 }
 0xa1b   : > { %v2050_v39 = vpop.xlane.xlu0 %2049 }
 0xa1c   : > { %v2054_v40 = vsub.f32 %v1992_v25, %v2050_v39 }
 0xa1e   : > { %v2056_v41 = vmul.f32 1.442695, %v2054_v40 }
 0xa20   : > { %3270 = vpow2.f32 %v2056_v41 }
 0xa2a   : > { %v3271_v44 = vpop.eup %3270 }
 0xa2b   : > { %v2060_v45 = vsel %vm1141_vm3, %v3271_v44, 0.0 }
 0xa2c   : > { %2061 = vadd.xlane.f32.xlu0 %v2060_v45 }
 0xa69   : > { %v1939_v46 = vpop.f32.mrb[36].mxu1 }
 0xa6a   : > { %v4141_v24 = vadd.f32 %v1939_v46, %v4097_v47  ;;  %v3081_v48 = vpop.f32.mrb[37].mxu1 }
 0xa6b   : > { %v1942_v28 = vpop.f32.mrb[38].mxu1 }
 0xa6c   : > { %v4144_v50 = vadd.f32 %v1942_v28, %v4099_v49  ;;  %v3082_v34 = vpop.f32.mrb[39].mxu1  ;;  %v3240_v28 = vld [vmem:[%s748_s13] sm:$0xff]  }
 0xa6d   : > { %v3242_v34 = vld [vmem:[%s4197_s15] sm:$0xff]  }
 0xa71   : > { %v2042_v51 = vpop.f32.mrb[40].mxu1 }
 0xa72   : > { %v3093_v52 = vpop.f32.mrb[41].mxu1  ;;  %v2051_v53 = vsel %vm1141_vm3, %v2042_v51, -inf }
 0xa73   : > { %2052 = vmax.xlane.f32.xlu1 %v2051_v53  ;;  %v2045_v54 = vpop.f32.mrb[42].mxu1 }
 0xa74   : > { %v3094_v55 = vpop.f32.mrb[43].mxu1 }
 0xa84   : > { %2122 = vrot.lane.b32.xlu1 %v3979_v43, %s3538_s22 }
 0xab9   : > { %v2062_v56 = vpop.xlane.xlu0 %2061 }
 0xaba   : > { %3272 = vrcp.f32 %v2062_v56 }
 0xac4   : > { %v3273_v47 = vpop.eup %3272 }
 0xac5   : > { %v2068_v57 = vmul.f32 %v3273_v47, %v3271_v44 }
 0xac7   : > { %v2070_v58 = vadd.f32 %v2068_v57, %v1796_v16  ;;  %v2072_v14 = vpack.c.bf16 %v2068_v57, %v2068_v57 }
 0xac9   : > { %v2231_v59 = vmul.f32 0.25, %v2070_v58  ;;  %v2876_v58 = vld [vmem:[%s903_s24] ss:$0 sm:$0xff] }
 0xacb   : > { %2233 = vst.msk [vmem:[%s4150_s23] sm:$0xff] %vm1141_vm3, %v2231_v59 }
 0xb00   : > { %v2053_v49 = vpop.xlane.xlu1 %2052 }
 0xb01   : > { %v2055_v60 = vsub.f32 %v2042_v51, %v2053_v49  ;;  %v3243_v51 = vld [vmem:[%s4197_s15 + $0x8] sm:$0xff]  }
 0xb03   : > { %v2058_v61 = vmul.f32 1.442695, %v2055_v60 }
 0xb04   : > { %v2123_v63 = vpop.permute.xlu1 %2122 }
 0xb05   : > { %3274 = vpow2.f32 %v2058_v61  ;;  %v2128_v1 = vsel %vm1263_vm4, %v2123_v63, 0 }
 0xb06   : > { %3102 = vmatpush3.bf16.msra.mxu1 %v2128_v1 }
 0xb07   : > { %3113 = vmatprep.subr.bf16.mxu1 %v3534_v0 }
 0xb0f   : > { %v3275_v43 = vpop.eup %3274 }
 0xb10   : > { %v2063_v2 = vsel %vm1141_vm3, %v3275_v43, 0.0 }
 0xb11   : > { %2064 = vadd.xlane.f32.xlu0 %v2063_v2 }
 0xb27   : > { %2074 = vrot.lane.b32.xlu0 %v3977_v42, %s3538_s22  ;;  %s906_s22 = scalar_lea.vmem %s4418_s2, %s3900_s25 }
 0xb28   : > { %v2877_v63 = vld [vmem:[%s906_s22] ss:$0 sm:$0xff] }
 0xb9e   : > { %v2065_v3 = vpop.xlane.xlu0 %2064 }
 0xb9f   : > { %3276 = vrcp.f32 %v2065_v3 }
 0xba2   : > { %v2075_v6 = vpop.permute.xlu0 %2074 }
 0xba3   : > { %v2080_v10 = vsel %vm1263_vm4, %v2075_v6, 0  ;;  %v3244_v6 = vld [vmem:[%s4197_s15 + $0x10] sm:$0xff]  }
 0xba4   : > { %3096 = vmatpush3.bf16.msra.mxu0 %v2080_v10  ;;  %v3245_v10 = vld [vmem:[%s4197_s15 + $0x18] sm:$0xff]  }
 0xba5   : > { %3107 = vmatprep.subr.bf16.mxu0 %v3534_v0 }
 0xba7   : > { %3098 = vmatmul.mubr.msk.bf16.vlgmr.msra.gmra.mrb[36].mxu0 %vm1141_vm3, %v2072_v14  ;;  %v2878_v14 = vld [vmem:[%s756_s20] ss:$0 sm:$0xff] }
 0xba8   : > { %3109 = vmatprep.mubr.msk.bf16.mxu0 %vm3535_vm0, %v3534_v0  ;;  %3108 = vmatpush3.bf16.msra.mxu0 %v2177_v33 }
 0xba9   : > { %v3277_v4 = vpop.eup %3276  ;;  %3121 = vmatprep.subr.bf16.mxu0 %v3534_v0 }
 0xbaa   : > { %v2069_v11 = vmul.f32 %v3277_v4, %v3275_v43 }
 0xbac   : > { %v2071_v42 = vadd.f32 %v2069_v11, %v4106_v5  ;;  %v2073_v12 = vpack.c.bf16 %v2069_v11, %v2069_v11 }
 0xbae   : > { %v2232_v13 = vmul.f32 0.25, %v2071_v42  ;;  %3104 = vmatmul.mubr.msk.bf16.vlgmr.msra.gmra.mrb[44].mxu1 %vm1141_vm3, %v2073_v12 }
 0xbaf   : > { %3117 = vmatprep.mubr.msk.bf16.mxu1 %vm3535_vm0, %v3534_v0  ;;  %3114 = vmatpush3.bf16.msra.mxu1 %v3240_v28 }
 0xbb0   : > { %2234 = vst.msk [vmem:[%s4150_s23 + $0x8] sm:$0xff] %vm1141_vm3, %v2232_v13  ;;  %3115 = vmatprep.subr.bf16.mxu1 %v3534_v0 }
 0xc7a   : > { %v2116_v16 = vpop.f32.mrb[36].mxu0 }
 0xc7b   : > { %v3099_v17 = vpop.f32.mrb[37].mxu0 }
 0xc7c   : > { %v2119_v18 = vpop.f32.mrb[38].mxu0 }
 0xc7d   : > { %v3100_v5 = vpop.f32.mrb[39].mxu0 }
 0xc81   : > { %v2164_v19 = vpop.f32.mrb[44].mxu1 }
 0xc82   : > { %v2170_v20 = vpack.c.bf16 %v2164_v19, %v2116_v16  ;;  %v3105_v21 = vpop.f32.mrb[45].mxu1 }
 0xc83   : > { %v2167_v22 = vpop.f32.mrb[46].mxu1 }
 0xc84   : > { %v3106_v23 = vpop.f32.mrb[47].mxu1  ;;  %3110 = vmatmul.mubr.msk.bf16.vlgmr.msra.gmra.mrb[40].mxu0 %vm1141_vm3, %v2170_v20 }
 0xc85   : > { %3129 = vmatprep.mubr.msk.bf16.mxu0 %vm3535_vm0, %v3534_v0  ;;  %3122 = vmatpush3.bf16.msra.mxu0 %v3242_v34 }
 0xc86   : > { %3123 = vmatprep.subr.bf16.mxu0 %v3534_v0 }
 0xc89   : > { %3124 = vmatpush3.bf16.msra.mxu0 %v3243_v51 }
 0xc8a   : > { %3125 = vmatprep.subr.bf16.mxu0 %v3534_v0 }
 0xc8d   : > { %3126 = vmatpush3.bf16.msra.mxu0 %v3244_v6 }
 0xc8e   : > { %3127 = vmatprep.subr.bf16.mxu0 %v3534_v0  ;;  %v2882_v0 = vld [vmem:[%s900_s21] ss:$0 sm:$0xff] }
 0xc91   : > { %3128 = vmatpush3.bf16.msra.mxu0 %v3245_v10 }
 0xd57   : > { %v2213_v25 = vpop.f32.mrb[40].mxu0 }
 0xd58   : > { %v2220_v62 = vadd.f32 %v2213_v25, %v4141_v24  ;;  %v3111_v26 = vpop.f32.mrb[41].mxu0 }
 0xd59   : > { %v2216_v27 = vpop.f32.mrb[42].mxu0 }
 0xd5a   : > { %v2229_v29 = vadd.f32 %v2875_v7, %v2220_v62  ;;  %v2221_v30 = vadd.f32 %v2216_v27, %v4144_v50  ;;  %v3112_v31 = vpop.f32.mrb[43].mxu0  ;;  %v3241_v50 = vld [vmem:[%s748_s13 + $0x8] sm:$0xff]   ;;  %s912_s13 = scalar_lea.vmem %s4421_s11, %s3900_s25 }
 0xd5b   : > { %3116 = vmatpush3.bf16.msra.mxu1 %v3241_v50  ;;  %v2889_v28 = vld [vmem:[%s912_s13] ss:$0 sm:$0xff] }
 0xd5c   : > { %v2230_v32 = vadd.f32 %v2875_v7, %v2221_v30  ;;  %v2235_v35 = vadd.f32 %v2229_v29, %v3917_v8 }
 0xd5e   : > { %v2239_v36 = vsel %vm950_vm2, %v2235_v35, 0.0  ;;  %v2236_v37 = vadd.f32 %v2230_v32, %v3919_v9 }
 0xd5f   : > { %2240 = vadd.xlane.f32.xlu1 %v2239_v36 }
 0xd60   : > { %v2242_v38 = vsel %vm950_vm2, %v2236_v37, 0.0 }
 0xd61   : > { %2243 = vadd.xlane.f32.xlu0 %v2242_v38 }
 0xdec   : > { %v2241_v39 = vpop.xlane.xlu1 %2240 }
 0xded   : > { %v2246_v40 = vmul.f32 0.03125, %v2241_v39 }
 0xdee   : > { %v2244_v41 = vpop.xlane.xlu0 %2243 }
 0xdef   : > { %v2248_v44 = vsub.f32 %v2235_v35, %v2246_v40  ;;  %v2247_v45 = vmul.f32 0.03125, %v2244_v41 }
 0xdf1   : > { %v2249_v46 = vsub.f32 %v2236_v37, %v2247_v45  ;;  %v2250_v24 = vmul.f32 %v2248_v44, %v2248_v44 }
 0xdf3   : > { %v2252_v8 = vsel %vm950_vm2, %v2250_v24, 0.0  ;;  %v2251_v48 = vmul.f32 %v2249_v46, %v2249_v46 }
 0xdf4   : > { %2253 = vadd.xlane.f32.xlu0 %v2252_v8  ;;  %v2888_v8 = vld [vmem:[%s909_s1] ss:$0 sm:$0xff] }
 0xdf5   : > { %v2255_v9 = vsel %vm950_vm2, %v2251_v48, 0.0 }
 0xdf6   : > { %2256 = vadd.xlane.f32.xlu1 %v2255_v9 }
 0xe81   : > { %v2254_v52 = vpop.xlane.xlu0 %2253 }
 0xe82   : > { %v2258_v53 = vmul.f32 0.03125, %v2254_v52 }
 0xe83   : > { %v2257_v54 = vpop.xlane.xlu1 %2256 }
 0xe84   : > { %v2260_v55 = vadd.f32 1e-05, %v2258_v53  ;;  %v2259_v56 = vmul.f32 0.03125, %v2257_v54 }
 0xe86   : > { %3278 = vrsqrt.f32 %v2260_v55  ;;  %v2261_v47 = vadd.f32 1e-05, %v2259_v56 }
 0xe88   : > { %3280 = vrsqrt.f32 %v2261_v47 }
 0xe90   : > { %v3279_v57 = vpop.eup %3278 }
 0xe91   : > { %v2264_v59 = vmul.f32 %v3279_v57, %v2248_v44 }
 0xe92   : > { %v3281_v49 = vpop.eup %3280 }
 0xe93   : > { %v2272_v60 = vmul.f32 %v2876_v58, %v2264_v59  ;;  %v2265_v61 = vmul.f32 %v3281_v49, %v2249_v46 }
 0xe95   : > { %v2273_v1 = vmul.f32 %v2876_v58, %v2265_v61  ;;  %v2280_v43 = vadd.f32 %v2877_v63, %v2272_v60 }
 0xe97   : > { %v2281_v2 = vadd.f32 %v2877_v63, %v2273_v1 }
 0xe99   : > { %v2282_v3 = vpack.c.bf16 %v2281_v2, %v2280_v43 }
 0xe9b   : > { %3118 = vmatmul.mubr.msk.bf16.vlgmr.msra.gmra.mrb[48].mxu1 %vm950_vm2, %v2282_v3 }
 0xf6e   : > { %v2343_v4 = vpop.f32.mrb[48].mxu1 }
 0xf6f   : > { %v2344_v11 = vadd.f32 %v2878_v14, %v2343_v4  ;;  %v3119_v42 = vpop.f32.mrb[49].mxu1 }
 0xf70   : > { %v2346_v12 = vpop.f32.mrb[50].mxu1 }
 0xf71   : > { %v2347_v13 = vadd.f32 %v2878_v14, %v2346_v12  ;;  %v3120_v15 = vpop.f32.mrb[51].mxu1  ;;  %v2350_v33 = vmax.f32 %v2344_v11, 0.0 }
 0xf73   : > { %v2351_v16 = vmax.f32 %v2347_v13, 0.0 }
 0xf75   : > { %v2352_v17 = vpack.c.bf16 %v2351_v16, %v2350_v33 }
 0xf77   : > { %3130 = vmatmul.mubr.msk.bf16.vlgmr.msra.gmra.mrb[44].mxu0 %vm2392_vm5, %v2352_v17 }
0x104a   : > { %v2430_v18 = vpop.f32.mrb[44].mxu0 }
0x104b   : > { %v2431_v5 = vadd.f32 %v2882_v0, %v2430_v18  ;;  %v3131_v19 = vpop.f32.mrb[45].mxu0 }
0x104c   : > { %v2433_v20 = vpop.f32.mrb[46].mxu0 }
0x104d   : > { %v2434_v21 = vadd.f32 %v2882_v0, %v2433_v20  ;;  %v3132_v22 = vpop.f32.mrb[47].mxu0  ;;  %v2437_v23 = vadd.f32 %v2431_v5, %v2280_v43 }
0x104f   : > { %v2441_v25 = vsel %vm950_vm2, %v2437_v23, 0.0  ;;  %v2438_v7 = vadd.f32 %v2434_v21, %v2281_v2 }
0x1050   : > { %2442 = vadd.xlane.f32.xlu0 %v2441_v25 }
0x1051   : > { %v2444_v62 = vsel %vm950_vm2, %v2438_v7, 0.0 }
0x1052   : > { %2445 = vadd.xlane.f32.xlu1 %v2444_v62 }
0x10dd   : > { %v2443_v26 = vpop.xlane.xlu0 %2442 }
0x10de   : > { %v2447_v27 = vmul.f32 0.03125, %v2443_v26 }
0x10df   : > { %v2446_v29 = vpop.xlane.xlu1 %2445 }
0x10e0   : > { %v2449_v30 = vsub.f32 %v2437_v23, %v2447_v27  ;;  %v2448_v31 = vmul.f32 0.03125, %v2446_v29 }
0x10e2   : > { %v2450_v32 = vsub.f32 %v2438_v7, %v2448_v31  ;;  %v2451_v35 = vmul.f32 %v2449_v30, %v2449_v30 }
0x10e4   : > { %v2453_v36 = vsel %vm950_vm2, %v2451_v35, 0.0  ;;  %v2452_v37 = vmul.f32 %v2450_v32, %v2450_v32 }
0x10e5   : > { %2454 = vadd.xlane.f32.xlu0 %v2453_v36 }
0x10e6   : > { %v2456_v38 = vsel %vm950_vm2, %v2452_v37, 0.0 }
0x10e7   : > { %2457 = vadd.xlane.f32.xlu1 %v2456_v38 }
0x1172   : > { %v2455_v39 = vpop.xlane.xlu0 %2454 }
0x1173   : > { %v2459_v40 = vmul.f32 0.03125, %v2455_v39 }
0x1174   : > { %v2458_v41 = vpop.xlane.xlu1 %2457 }
0x1175   : > { %v2461_v44 = vadd.f32 1e-05, %v2459_v40  ;;  %v2460_v45 = vmul.f32 0.03125, %v2458_v41 }
0x1177   : > { %3282 = vrsqrt.f32 %v2461_v44  ;;  %v2462_v46 = vadd.f32 1e-05, %v2460_v45 }
0x1179   : > { %3284 = vrsqrt.f32 %v2462_v46 }
0x1181   : > { %v3283_v24 = vpop.eup %3282 }
0x1182   : > { %v2465_v48 = vmul.f32 %v3283_v24, %v2449_v30  ;;  %2486 = sbr.rel (%p2890_p0) target bundleno = 4491 (0x118b), region = 108 }
0x1183   : > { %v3285_v9 = vpop.eup %3284 }
0x1184   : > { %v2473_v50 = vmul.f32 %v2888_v8, %v2465_v48  ;;  %v2466_v34 = vmul.f32 %v3285_v9, %v2450_v32 }
0x1186   : > { %v2481_v51 = vadd.f32 %v2889_v28, %v2473_v50  ;;  %v2474_v52 = vmul.f32 %v2888_v8, %v2466_v34 }
0x1188   : > { %v2482_v53 = vadd.f32 %v2889_v28, %v2474_v52  ;;  %2487 = vst.msk [vmem:[#allocation2] sm:$0xff] (!%p2890_p0), %vm950_vm2, %v2481_v51 }
0x118a   : > { %2488 = vst.msk [vmem:[#allocation2 + $0x8] sm:$0xff] %vm950_vm2, %v2482_v53 }
0x118b PF: > { %p2891_p2 = scmp.ne.s32.totalorder %s3516_s30, 1 }
0x118c   : > { %2493 = vst.msk [vmem:[#allocation11] sm:$0xff] (!%p2891_p2), %vm950_vm2, %v2481_v51  ;;  %2494 = vst.msk [vmem:[#allocation11 + $0x8] sm:$0xff] (!%p2891_p2), %vm950_vm2, %v2482_v53 }
0x118d   : > { %2492 = sbr.rel (%p2891_p2) target bundleno = 4500 (0x1194), region = 112 }
0x1194 PF: > { %s3539_s25 = smov [#allocation11]   ;;  %p4422_p8 = scmp.eq.s32.totalorder %s3751_s14, 1 }
0x1195   : > { %s2509_s12 = sshll.u32 %s3539_s25, 4  ;;  %s2510_s12 = int_to_ptr.vmem [resolvable:$true] %s2509_s12 }
0x1196   : > { %s3404_s24 = scalar_lea.vmem %s2510_s12, 256  ;;  %p3411_p12 = scmp.lt.s32.totalorder %s2510_s12, %s2510_s12 }
0x1197   : > { %p3405_p3 = scmp.ne.s32.totalorder %s2510_s12, %s3404_s24  ;;  %p3412_p13 = scmp.lt.s32.totalorder %s3404_s24, %s3404_s24 }
0x1199   : > { %p3406_p7 = pnand %p3405_p3, %p4422_p8  ;;  %p3413_p4 = por %p3412_p13, %p3411_p12 }
0x119b   : > { %p3407_p6 = pneg %p3406_p7 }
0x119d   : > { %p3414_p10 = pnand %p3413_p4, %p3407_p6 }
0x119f   : > { %3417 = shalt.err (!%p3414_p10)
}
0x11a0   : > { %s4423_s2 = sld [smem:[#allocation38_spill]]  ;;  %p4424_p1 = pmov %p4422_p8 }
0x11a6   : > { %s3418_s22 = scalar_lea.hbm %s4423_s2, 256 }
0x11a7   : > { %p3419_p9 = scmp.ne.s32.totalorder %s4423_s2, %s3418_s22  ;;  %p3424_p0 = scmp.lt.u32.totalorder %s3418_s22, %s4423_s2 }
0x11a9   : > { %p3420_p11 = pnand %p3419_p9, %p4424_p1 }
0x11ab   : > { %p3421_p5 = pneg %p3420_p11 }
0x11ad   : > { %p3426_p2 = pnand %p3424_p0, %p3421_p5 }
0x11af   : > { %3429 = shalt.err (!%p3426_p2)
}
0x11b0   : > { %s3540_s20 = smov 128   ;;  %s4425_s27 = sld [smem:[#allocation24_spill]] }
0x11b1   : > { %s3541_s7 = smov 8   ;;  %p4426_p3 = pmov %p4424_p1 }
0x11b2   : > { %s2911_s15 = sshll.u32 %s3516_s30, 8  ;;  %s4427_s25 = sld [smem:[#allocation39_spill]] }
0x11b3   : > { %3144 = dma.vmem_to_hbm [thread:$0]  (%p4426_p3), %s2510_s12, 256, %s4423_s2, [#allocation5], %s3540_s20, %s3540_s20, %s3541_s7  }
0x11b4   : > { %s2527_s26 = sshll.u32 %s4150_s23, 4  ;;  %s2496_s19 = scalar_lea.sflag [#allocation13], %s3875_s9  ;;  %s4267_s26 = int_to_ptr.vmem [resolvable:$true] %s2527_s26 }
0x11b5   : > { %s3430_s22 = scalar_lea.vmem %s4267_s26, 256  ;;  %s3542_s29 = smov [#allocation12]  }
0x11b6   : > { %p3431_p8 = scmp.ne.s32.totalorder %s4267_s26, %s3430_s22  ;;  %p4428_p7 = scmp.ne.s32.totalorder %s4425_s27, 0 }
0x11b7   : > { %s3434_s12 = sshll.u32 %s3542_s29, 4  ;;  %s3435_s12 = int_to_ptr.vmem [resolvable:$false] %s3434_s12 }
0x11b8   : > { %s4264_s24 = scalar_lea.hbm %s4427_s25, %s2911_s15  ;;  %p3432_p6 = pnand %p3431_p8, %p4428_p7 }
0x11b9   : > { %s3436_s30 = scalar_lea.vmem %s3435_s12, 512  ;;  %p3437_p13 = scmp.lt.s32.totalorder %s4267_s26, %s3435_s12 }
0x11ba   : > { %p3433_p12 = pneg %p3432_p6  ;;  %p3438_p4 = scmp.lt.s32.totalorder %s3436_s30, %s3430_s22 }
0x11bc   : > { %p3439_p10 = por %p3438_p4, %p3437_p13 }
0x11be   : > { %p3440_p9 = pnand %p3439_p10, %p3433_p12 }
0x11c0   : > { %3443 = shalt.err (!%p3440_p9)
}
0x11c1   : > { %s3444_s23 = scalar_lea.hbm %s4264_s24, 256  ;;  %s3448_s21 = scalar_lea.hbm %s4427_s25, 512 }
0x11c2   : > { %p3445_p1 = scmp.ne.s32.totalorder %s4264_s24, %s3444_s23  ;;  %p3449_p0 = scmp.lt.u32.totalorder %s4264_s24, %s4427_s25 }
0x11c3   : > { %p3450_p2 = scmp.lt.u32.totalorder %s3448_s21, %s3444_s23  ;;  %p3452_p8 = scmp.lt.u32.totalorder %s3444_s23, %s4264_s24 }
0x11c4   : > { %p3446_p11 = pnand %p3445_p1, %p4428_p7 }
0x11c5   : > { %p3451_p3 = por %p3450_p2, %p3449_p0 }
0x11c6   : > { %p3447_p5 = pneg %p3446_p11 }
0x11c7   : > { %p3453_p6 = por %p3452_p8, %p3451_p3 }
0x11c9   : > { %p3454_p12 = pnand %p3453_p6, %p3447_p5 }
0x11cb   : > { %3457 = shalt.err (!%p3454_p12)
}
0x11cc   : > { %3145 = dma.vmem_to_hbm [thread:$0]  (%p4428_p7), %s4267_s26, 256, %s4264_s24, %s2496_s19, %s3540_s20, %s3540_s20, %s3541_s7  }
0x11cd   : > { %p4429_p13 = scmp.eq.s32.totalorder %s3751_s14, 1 }
0x11cf   : > { %3495 = dma.done.wait (%p4429_p13), [#allocation5], 256   ;;  %p4430_p4 = pmov %p4429_p13 }
0x11d1   : > { %3497 = vsyncadd (%p4430_p4), [#allocation5], 4294967040 }
0x11d2 PF: > { %s4431_s15 = sld [smem:[#allocation19_spill]]  ;;  %s4432_s11 = sld [smem:[#allocation25_spill]] }
0x11d3   : > { %s4433_s13 = sld [smem:[#allocation21_spill]] }
0x11d8   : > { %s2546_s22 = sand.u32 1, %s4431_s15   ;;  %p4434_p10 = scmp.ne.s32.totalorder %s4432_s11, 0 }
0x11d9   : > { %p4435_p9 = scmp.ge.s32.totalorder %s4433_s13, 2  ;;  %s2547_s27 = scalar_lea.sflag [#allocation13], %s2546_s22 }
0x11db   : > { %p3164_p1 = pnand %p4435_p9, %p4434_p10 }
0x11dd   : > { %3499 = dma.done.wait (!%p3164_p1), %s2547_s27, 256  }
0x11de   : > { %3501 = vsyncadd (!%p3164_p1), %s2547_s27, 4294967040  ;;  %s40_s19 = sadd.s32 1, %s4433_s13   ;;  %s4436_s9 = sld [smem:[#allocation20_spill]] }
0x11df   : > { %p37_p11 = scmp.ge.s32.totalorder %s40_s19, 4   ;;  %s4437_s29 = sld [smem:[#allocation23_spill]] }
0x11e0   : > { %s4438_s14 = sld [smem:[#allocation22_spill]]  ;;  %s4439_s27 = smov %s3508_s28 }
0x11e1   : > { %s4441_s30 = smov %s3520_s0  ;;  %39 = sbr.rel (!%p37_p11) target bundleno = 25 (0x19), region = 223 }
0x11e4   : > { %s4440_s28 = smov %s4436_s9 }
0x11e6   : > { %s4442_s0 = smov %s4438_s14 }
0x11e8   :  { %2552 = vsyncpa [#allocation4], 1 }
0x11e9   :  { %2554 = vsyncpa [#allocation4 + $0x1], 1 }
0x11ea   :  { %2555 = vsyncpa [#allocation7], 1 }
0x11eb   :  { %2557 = vsyncpa [#allocation7 + $0x1], 1 }
0x11ec   :  { %2558 = vsyncpa [#allocation10], 1 }
0x11ed   :  { %2560 = vsyncpa [#allocation10 + $0x1], 1 }
0x11ee   :  { %2561 = vsyncpa [#allocation5], 1 }
0x11ef   :  { %2563 = vsyncpa [#allocation5 + $0x1], 1 }
0x11f0   :  { %2564 = vsyncpa [#allocation13], 1 }
0x11f1   :  { %2566 = vsyncpa [#allocation13 + $0x1], 1 }

</bundles_post_ra>
